<compile_context>
chip_gen: v7x
topology: tpu7x:2x2x1
jax: 0.10.0
libtpu: 0.0.40
codegen_flags: <defaults>
</compile_context>

<pallas_src>
import jax
import jax.numpy as jnp
from jax.experimental import pallas as pl
from jax.experimental.pallas import tpu as pltpu

_EPS = 1e-5
_NCORES = 2          # leading "parallel" grid axis for pass 1 (v7x megacore)
_VMEM_BUDGET = 16 << 20
_VMEM_LIMIT = 48 << 20


# --------------------------------------------------------------------------
# Kernels
# --------------------------------------------------------------------------
def _conv_stats_kernel(x_ref, w_ref, o_ref, stats_ref):
    """One lane-dense M-tile of the conv + fused BN-statistics accumulation.

    x_ref:     (TM, pack*K) bf16 packed im2col rows for this tile
    w_ref:     (pack*K, 128) bf16 block-diagonal conv weight (resident)
    o_ref:     (TM, 128)     bf16 lane-dense conv output tile
    stats_ref: (2, 128)      f32 per-lane [sum; sum_sq] accumulator (resident
                             per core; pack replicas folded in the wrapper)
    """
    @pl.when(pl.program_id(1) == 0)
    def _():
        stats_ref[...] = jnp.zeros_like(stats_ref)

    # Single MXU matmul per tile, f32 accumulation, lane-dense output.
    acc = jnp.dot(x_ref[...], w_ref[...], preferred_element_type=jnp.float32)

    # Fused single-pass statistics on full 128-lane vregs.
    s = jnp.sum(acc, axis=0, keepdims=True)          # (1, 128)
    s2 = jnp.sum(acc * acc, axis=0, keepdims=True)   # (1, 128)
    stats_ref[...] += jnp.concatenate([s, s2], axis=0)

    o_ref[...] = acc.astype(o_ref.dtype)


def _bn_sigmoid_kernel(y_ref, scale_ref, shift_ref, o_ref):
    """Lane-dense BN affine + sigmoid gate.

    y_ref:       (TM, 128) bf16 lane-dense conv output tile
    scale/shift: (1, 128)  f32 per-lane (channel-tiled) affine parameters
    o_ref:       (TM, 128) out dtype
    """
    y = y_ref[...].astype(jnp.float32) * scale_ref[...] + shift_ref[...]
    # sigmoid(y) = 0.5 * (tanh(0.5*y) + 1): single EUP push, no divide.
    o_ref[...] = (0.5 * jnp.tanh(0.5 * y) + 0.5).astype(o_ref.dtype)


# --------------------------------------------------------------------------
# Wrapper-side layout plumbing
# --------------------------------------------------------------------------
def _round_up(x, m):
    return (x + m - 1) // m * m


def _im2col_3x3(x_nhwc):
    """(N, H, W, C) -> (N*H*W, 9*C) bf16 patches for 3x3 / stride 1 / pad 1."""
    N, H, W, C = x_nhwc.shape
    xb = x_nhwc.astype(jnp.bfloat16)
    xp = jnp.pad(xb, ((0, 0), (1, 1), (1, 1), (0, 0)))
    cols = [xp[:, dy:dy + H, dx:dx + W, :] for dy in range(3) for dx in range(3)]
    return jnp.concatenate(cols, axis=-1).reshape(N * H * W, 9 * C)


def _pick_dense_tile(mp, pack_k, out_bytes,
                     budget=_VMEM_BUDGET, cap=2048):
    """Largest lane-dense row tile (multiple of 16, <= cap) within the VMEM budget."""
    def cost(t):
        return (2 * t * pack_k * 2          # double-buffered bf16 x tile
                + 2 * t * 128 * out_bytes   # double-buffered output tile
                + pack_k * 128 * 2          # resident block-diag weight
                + 2 * 2 * 128 * 4)          # stats accumulator
    t = _round_up(min(cap, _round_up(mp, 16)), 16)
    while t > 16 and cost(t) > budget:
        t = _round_up(t // 2, 16)
    return t


def _pick_pass2_tile(tile1, n_tiles, cap=4096):
    """Pass-2 tile: a multiple of tile1 that divides mp_pad, up to `cap` rows."""
    best = tile1
    for k in range(2, n_tiles + 1):
        if n_tiles % k == 0 and tile1 * k <= cap:
            best = tile1 * k
    return best


def _conv_bn_sigmoid_layer(x_nhwc, w_oihw, gamma, beta, out_dtype):
    """One conv3x3 -> BatchNorm2d(train) -> sigmoid layer. NHWC in, NHWC out."""
    N, H, W, Cin = x_nhwc.shape
    Cout = w_oihw.shape[0]
    M = N * H * W
    K = 9 * Cin

    # TODO(synk): general Cout would need channel padding for the lane-dense path.
    assert Cout <= 128 and 128 % Cout == 0, "lane-dense path needs Cout | 128"
    pack = 128 // Cout
    pack_k = pack * K

    # im2col rows (bf16), padded to a multiple of `pack`, re-grouped so each
    # dense row carries `pack` consecutive output pixels.
    x_col = _im2col_3x3(x_nhwc)                               # (M, K)
    mp_valid = pl.cdiv(M, pack)
    m_pad1 = mp_valid * pack
    if m_pad1 != M:
        x_col = jnp.pad(x_col, ((0, m_pad1 - M), (0, 0)))
    x_dense = x_col.reshape(mp_valid, pack_k)                 # (M/pack, pack*K)

    # (dy, dx, cin, cout)-ordered weight, replicated block-diagonally so one
    # matmul emits the (rows, pack*Cout=128) lane-dense layout natively.
    w_col = jnp.transpose(w_oihw, (2, 3, 1, 0)).reshape(K, Cout)
    w_col = w_col.astype(jnp.bfloat16)
    w_bd = jnp.kron(jnp.eye(pack, dtype=jnp.bfloat16), w_col)  # (pack*K, 128)

    conv_dtype = jnp.bfloat16
    tile1 = _pick_dense_tile(mp_valid, pack_k, jnp.dtype(conv_dtype).itemsize)
    mt = _round_up(pl.cdiv(mp_valid, tile1), _NCORES)
    mt_per_core = mt // _NCORES
    mp_pad = mt * tile1
    if mp_pad != mp_valid:
        # Zero-padded rows produce zero conv outputs -> contribute 0 to stats.
        x_dense = jnp.pad(x_dense, ((0, mp_pad - mp_valid), (0, 0)))

    # ---- pass 1: lane-dense conv matmul + fused sum/sumsq statistics -------
    conv_dense, stats = pl.pallas_call(
        _conv_stats_kernel,
        grid=(_NCORES, mt_per_core),
        in_specs=[
            pl.BlockSpec((tile1, pack_k),
                         lambda c, i: (c * mt_per_core + i, 0)),
            pl.BlockSpec((pack_k, 128), lambda c, i: (0, 0)),
        ],
        out_specs=(
            pl.BlockSpec((tile1, 128),
                         lambda c, i: (c * mt_per_core + i, 0)),
            pl.BlockSpec((None, 2, 128), lambda c, i: (c, 0, 0)),
        ),
        out_shape=(
            jax.ShapeDtypeStruct((mp_pad, 128), conv_dtype),
            jax.ShapeDtypeStruct((_NCORES, 2, 128), jnp.float32),
        ),
        compiler_params=pltpu.CompilerParams(
            dimension_semantics=("parallel", "arbitrary"),
            vmem_limit_bytes=_VMEM_LIMIT),
    )(x_dense, w_bd)

    # ---- tiny per-channel fold in the wrapper -------------------------------
    stats = jnp.sum(stats, axis=0)                        # sum the per-core partials
    s = stats[0].reshape(pack, Cout).sum(axis=0)          # fold pack replicas
    s2 = stats[1].reshape(pack, Cout).sum(axis=0)
    cnt = jnp.float32(M)                                   # true element count
    mean = s / cnt
    var = jnp.maximum(s2 / cnt - mean * mean, 0.0)         # biased, like PyTorch
    inv = jax.lax.rsqrt(var + _EPS)
    scale_c = gamma.astype(jnp.float32) * inv              # (Cout,)
    shift_c = beta.astype(jnp.float32) - mean * scale_c    # (Cout,)
    scale_lane = jnp.tile(scale_c, pack).reshape(1, 128)   # lane j -> channel j % Cout
    shift_lane = jnp.tile(shift_c, pack).reshape(1, 128)

    # ---- pass 2: lane-dense BN affine + sigmoid (own, larger tiling) --------
    tile2 = _pick_pass2_tile(tile1, mt)
    mt2 = mp_pad // tile2
    y_dense = pl.pallas_call(
        _bn_sigmoid_kernel,
        grid=(mt2,),
        in_specs=[
            pl.BlockSpec((tile2, 128), lambda i: (i, 0)),
            pl.BlockSpec((1, 128), lambda i: (0, 0)),
            pl.BlockSpec((1, 128), lambda i: (0, 0)),
        ],
        out_specs=pl.BlockSpec((tile2, 128), lambda i: (i, 0)),
        out_shape=jax.ShapeDtypeStruct((mp_pad, 128), out_dtype),
        compiler_params=pltpu.CompilerParams(
            dimension_semantics=("parallel",),
            vmem_limit_bytes=_VMEM_LIMIT),
    )(conv_dense, scale_lane, shift_lane)

    # Strip padding. (M/pack, 128) row-major == (M, Cout) row-major.
    y = y_dense[:mp_valid].reshape(m_pad1, Cout)
    if m_pad1 != M:
        y = y[:M]
    return y.reshape(N, H, W, Cout)


@jax.jit
def conv_block_forward(x_nchw, w1_oihw, gamma1, beta1, w2_oihw, gamma2, beta2):
    """x_nchw: (N, Cin, H, W); conv weights in PyTorch (Cout, Cin, 3, 3) layout.

    Returns (N, Cout, H, W), matching the PyTorch ConvBlock forward.
    """
    # NCHW -> NHWC, casting to bf16 once (im2col / MXU inputs are bf16 anyway).
    x = jnp.transpose(x_nchw.astype(jnp.bfloat16), (0, 2, 3, 1))
    y1 = _conv_bn_sigmoid_layer(x, w1_oihw, gamma1, beta1, out_dtype=jnp.bfloat16)
    y2 = _conv_bn_sigmoid_layer(y1, w2_oihw, gamma2, beta2, out_dtype=jnp.float32)
    return jnp.transpose(y2, (0, 3, 1, 2))                  # back to NCHW, f32


if __name__ == "__main__":
    key = jax.random.PRNGKey(0)
    k_x, k_w1, k_w2 = jax.random.split(key, 3)

    N, Cin, Cout, H, W = 2, 4, 8, 16, 16

    x = jax.random.normal(k_x, (N, Cin, H, W), dtype=jnp.float32)

    # conv3x3 weights (PyTorch OIHW layout), deterministic init; no bias.
    w1 = jax.random.normal(k_w1, (Cout, Cin, 3, 3), dtype=jnp.float32) * 0.1
    w2 = jax.random.normal(k_w2, (Cout, Cout, 3, 3), dtype=jnp.float32) * 0.1

    # BatchNorm2d affine params: PyTorch default init (gamma=1, beta=0).
    gamma1 = jnp.ones((Cout,), jnp.float32)
    beta1 = jnp.zeros((Cout,), jnp.float32)
    gamma2 = jnp.ones((Cout,), jnp.float32)
    beta2 = jnp.zeros((Cout,), jnp.float32)

    out = conv_block_forward(x, w1, gamma1, beta1, w2, gamma2, beta2)
    out = jax.block_until_ready(out)
    assert out.shape == (N, Cout, H, W), out.shape
    assert bool(jnp.all(jnp.isfinite(out)))
    print("KERNEL_OK")
</pallas_src>

<mosaic_0001>
module attributes {stable_mosaic.version = 11 : i64} {
  func.func @_conv_stats_kernel(%arg0: i32, %arg1: i32, %arg2: memref<32x576xbf16, #tpu.memory_space<vmem>>, %arg3: memref<576x128xbf16, #tpu.memory_space<vmem>>, %arg4: memref<32x128xbf16, #tpu.memory_space<vmem>>, %arg5: memref<1x2x128xf32, #tpu.memory_space<vmem>>) attributes {dimension_semantics = [#tpu.dimension_semantics<parallel>, #tpu.dimension_semantics<arbitrary>], iteration_bounds = array<i64: 2, 1>, scalar_prefetch = 0 : i64, scratch_operands = 0 : i64, tpu.core_type = #tpu.core_type<tc>, window_params = [{transform_indices = @transform_0, window_bounds = array<i64: 32, 576>}, {pipeline_mode = #tpu.pipeline_mode<synchronous>, transform_indices = @transform_1, window_bounds = array<i64: 576, 128>}, {transform_indices = @transform_2, window_bounds = array<i64: 32, 128>}, {transform_indices = @transform_3, window_bounds = array<i64: 1, 2, 128>}]} {
    %c0_i32 = arith.constant 0 : i32
    %0 = arith.cmpi eq, %arg1, %c0_i32 : i32
    %1 = arith.extui %0 : i1 to i32
    %c0_i32_0 = arith.constant 0 : i32
    %2 = arith.cmpi ne, %1, %c0_i32_0 : i32
    scf.if %2 {
      %cst_14 = arith.constant 0.000000e+00 : f32
      %20 = vector.broadcast %cst_14 : f32 to vector<2x128xf32>
      %c0_15 = arith.constant 0 : index
      %c0_16 = arith.constant 0 : index
      %c0_17 = arith.constant 0 : index
      %21 = vector.load %arg5[%c0_15, %c0_16, %c0_17] : memref<1x2x128xf32, #tpu.memory_space<vmem>>, vector<1x2x128xf32>
      %22 = vector.shape_cast %21 : vector<1x2x128xf32> to vector<2x128xf32>
      %23 = vector.shape_cast %20 : vector<2x128xf32> to vector<1x2x128xf32>
      tpu.vector_store %arg5[%c0_15, %c0_16, %c0_17], %23 {strides = array<i32>} : memref<1x2x128xf32, #tpu.memory_space<vmem>>, vector<1x2x128xf32>,
    } else {
    }
    %c0 = arith.constant 0 : index
    %c0_1 = arith.constant 0 : index
    %3 = vector.load %arg2[%c0, %c0_1] : memref<32x576xbf16, #tpu.memory_space<vmem>>, vector<32x576xbf16>
    %c0_2 = arith.constant 0 : index
    %c0_3 = arith.constant 0 : index
    %4 = vector.load %arg3[%c0_2, %c0_3] : memref<576x128xbf16, #tpu.memory_space<vmem>>, vector<576x128xbf16>
    %cst = arith.constant dense<0.000000e+00> : vector<32x128xf32>
    %5 = tpu.matmul %3, %4, %cst {dimension_numbers = #tpu.dot_dimension_numbers<[1], [0], [0], [1], [0, 0, 1, 1], [], []>} : vector<32x576xbf16>, vector<576x128xbf16>, vector<32x128xf32> -> vector<32x128xf32>
    %cst_4 = arith.constant dense<0.000000e+00> : vector<128xf32>
    %6 = vector.multi_reduction <add>, %5, %cst_4 [0] : vector<32x128xf32> to vector<128xf32>
    %7 = vector.shape_cast %6 : vector<128xf32> to vector<1x128xf32>
    %8 = arith.mulf %5, %5 : vector<32x128xf32>
    %cst_5 = arith.constant dense<0.000000e+00> : vector<128xf32>
    %9 = vector.multi_reduction <add>, %8, %cst_5 [0] : vector<32x128xf32> to vector<128xf32>
    %10 = vector.shape_cast %9 : vector<128xf32> to vector<1x128xf32>
    %c0_6 = arith.constant 0 : index
    %c0_7 = arith.constant 0 : index
    %c0_8 = arith.constant 0 : index
    %11 = vector.load %arg5[%c0_6, %c0_7, %c0_8] : memref<1x2x128xf32, #tpu.memory_space<vmem>>, vector<1x2x128xf32>
    %12 = vector.shape_cast %11 : vector<1x2x128xf32> to vector<2x128xf32>
    %13 = tpu.concatenate %7, %10 in 0 : vector<1x128xf32>, vector<1x128xf32> -> vector<2x128xf32>
    %14 = arith.addf %12, %13 : vector<2x128xf32>
    %c0_9 = arith.constant 0 : index
    %c0_10 = arith.constant 0 : index
    %c0_11 = arith.constant 0 : index
    %15 = vector.load %arg5[%c0_9, %c0_10, %c0_11] : memref<1x2x128xf32, #tpu.memory_space<vmem>>, vector<1x2x128xf32>
    %16 = vector.shape_cast %15 : vector<1x2x128xf32> to vector<2x128xf32>
    %17 = vector.shape_cast %14 : vector<2x128xf32> to vector<1x2x128xf32>
    tpu.vector_store %arg5[%c0_9, %c0_10, %c0_11], %17 {strides = array<i32>} : memref<1x2x128xf32, #tpu.memory_space<vmem>>, vector<1x2x128xf32>,
    %18 = arith.truncf %5 : vector<32x128xf32> to vector<32x128xbf16>
    %c0_12 = arith.constant 0 : index
    %c0_13 = arith.constant 0 : index
    %19 = vector.load %arg4[%c0_12, %c0_13] : memref<32x128xbf16, #tpu.memory_space<vmem>>, vector<32x128xbf16>
    tpu.vector_store %arg4[%c0_12, %c0_13], %18 {strides = array<i32>} : memref<32x128xbf16, #tpu.memory_space<vmem>>, vector<32x128xbf16>,
    return
  }
  func.func @transform_0(%arg0: i32, %arg1: i32) -> (i32, i32) {
    %c1_i32 = arith.constant 1 : i32
    %0 = arith.muli %arg0, %c1_i32 : i32
    %1 = arith.addi %0, %arg1 : i32
    %c0_i32 = arith.constant 0 : i32
    %c0_i32_0 = arith.constant 0 : i32
    return %1, %c0_i32 : i32, i32
  }
  func.func @transform_1(%arg0: i32, %arg1: i32) -> (i32, i32) {
    %c0_i32 = arith.constant 0 : i32
    %c0_i32_0 = arith.constant 0 : i32
    %c0_i32_1 = arith.constant 0 : i32
    return %c0_i32, %c0_i32_0 : i32, i32
  }
  func.func @transform_2(%arg0: i32, %arg1: i32) -> (i32, i32) {
    %c1_i32 = arith.constant 1 : i32
    %0 = arith.muli %arg0, %c1_i32 : i32
    %1 = arith.addi %0, %arg1 : i32
    %c0_i32 = arith.constant 0 : i32
    %c0_i32_0 = arith.constant 0 : i32
    return %1, %c0_i32 : i32, i32
  }
  func.func @transform_3(%arg0: i32, %arg1: i32) -> (i32, i32, i32) {
    %c0_i32 = arith.constant 0 : i32
    %c0_i32_0 = arith.constant 0 : i32
    %c0_i32_1 = arith.constant 0 : i32
    return %arg0, %c0_i32, %c0_i32_0 : i32, i32, i32
  }
}

module attributes {stable_mosaic.version = 11 : i64} {
  func.func @_bn_sigmoid_kernel(%arg0: i32, %arg1: memref<64x128xbf16, #tpu.memory_space<vmem>>, %arg2: memref<1x128xf32, #tpu.memory_space<vmem>>, %arg3: memref<1x128xf32, #tpu.memory_space<vmem>>, %arg4: memref<64x128xbf16, #tpu.memory_space<vmem>>) attributes {dimension_semantics = [#tpu.dimension_semantics<parallel>], iteration_bounds = array<i64: 1>, scalar_prefetch = 0 : i64, scratch_operands = 0 : i64, tpu.core_type = #tpu.core_type<tc>, window_params = [{transform_indices = @transform_0, window_bounds = array<i64: 64, 128>}, {pipeline_mode = #tpu.pipeline_mode<synchronous>, transform_indices = @transform_1, window_bounds = array<i64: 1, 128>}, {pipeline_mode = #tpu.pipeline_mode<synchronous>, transform_indices = @transform_2, window_bounds = array<i64: 1, 128>}, {transform_indices = @transform_3, window_bounds = array<i64: 64, 128>}]} {
    %c0 = arith.constant 0 : index
    %c0_0 = arith.constant 0 : index
    %0 = vector.load %arg1[%c0, %c0_0] : memref<64x128xbf16, #tpu.memory_space<vmem>>, vector<64x128xbf16>
    %1 = arith.extf %0 : vector<64x128xbf16> to vector<64x128xf32>
    %c0_1 = arith.constant 0 : index
    %c0_2 = arith.constant 0 : index
    %2 = vector.load %arg2[%c0_1, %c0_2] : memref<1x128xf32, #tpu.memory_space<vmem>>, vector<1x128xf32>
    %3 = vector.broadcast %2 : vector<1x128xf32> to vector<64x128xf32>
    %4 = arith.mulf %1, %3 : vector<64x128xf32>
    %c0_3 = arith.constant 0 : index
    %c0_4 = arith.constant 0 : index
    %5 = vector.load %arg3[%c0_3, %c0_4] : memref<1x128xf32, #tpu.memory_space<vmem>>, vector<1x128xf32>
    %6 = vector.broadcast %5 : vector<1x128xf32> to vector<64x128xf32>
    %7 = arith.addf %4, %6 : vector<64x128xf32>
    %cst = arith.constant 5.000000e-01 : f32
    %8 = vector.broadcast %cst : f32 to vector<64x128xf32>
    %9 = arith.mulf %8, %7 : vector<64x128xf32>
    %10 = math.tanh %9 : vector<64x128xf32>
    %cst_5 = arith.constant 5.000000e-01 : f32
    %11 = vector.broadcast %cst_5 : f32 to vector<64x128xf32>
    %12 = arith.mulf %11, %10 : vector<64x128xf32>
    %cst_6 = arith.constant 5.000000e-01 : f32
    %13 = vector.broadcast %cst_6 : f32 to vector<64x128xf32>
    %14 = arith.addf %12, %13 : vector<64x128xf32>
    %15 = arith.truncf %14 : vector<64x128xf32> to vector<64x128xbf16>
    %c0_7 = arith.constant 0 : index
    %c0_8 = arith.constant 0 : index
    %16 = vector.load %arg4[%c0_7, %c0_8] : memref<64x128xbf16, #tpu.memory_space<vmem>>, vector<64x128xbf16>
    tpu.vector_store %arg4[%c0_7, %c0_8], %15 {strides = array<i32>} : memref<64x128xbf16, #tpu.memory_space<vmem>>, vector<64x128xbf16>,
    return
  }
  func.func @transform_0(%arg0: i32) -> (i32, i32) {
    %c0_i32 = arith.constant 0 : i32
    %c0_i32_0 = arith.constant 0 : i32
    return %arg0, %c0_i32 : i32, i32
  }
  func.func @transform_1(%arg0: i32) -> (i32, i32) {
    %c0_i32 = arith.constant 0 : i32
    %c0_i32_0 = arith.constant 0 : i32
    %c0_i32_1 = arith.constant 0 : i32
    return %c0_i32, %c0_i32_0 : i32, i32
  }
  func.func @transform_2(%arg0: i32) -> (i32, i32) {
    %c0_i32 = arith.constant 0 : i32
    %c0_i32_0 = arith.constant 0 : i32
    %c0_i32_1 = arith.constant 0 : i32
    return %c0_i32, %c0_i32_0 : i32, i32
  }
  func.func @transform_3(%arg0: i32) -> (i32, i32) {
    %c0_i32 = arith.constant 0 : i32
    %c0_i32_0 = arith.constant 0 : i32
    return %arg0, %c0_i32 : i32, i32
  }
}

module attributes {stable_mosaic.version = 11 : i64} {
  func.func @_conv_stats_kernel(%arg0: i32, %arg1: i32, %arg2: memref<32x1152xbf16, #tpu.memory_space<vmem>>, %arg3: memref<1152x128xbf16, #tpu.memory_space<vmem>>, %arg4: memref<32x128xbf16, #tpu.memory_space<vmem>>, %arg5: memref<1x2x128xf32, #tpu.memory_space<vmem>>) attributes {dimension_semantics = [#tpu.dimension_semantics<parallel>, #tpu.dimension_semantics<arbitrary>], iteration_bounds = array<i64: 2, 1>, scalar_prefetch = 0 : i64, scratch_operands = 0 : i64, tpu.core_type = #tpu.core_type<tc>, window_params = [{transform_indices = @transform_0, window_bounds = array<i64: 32, 1152>}, {pipeline_mode = #tpu.pipeline_mode<synchronous>, transform_indices = @transform_1, window_bounds = array<i64: 1152, 128>}, {transform_indices = @transform_2, window_bounds = array<i64: 32, 128>}, {transform_indices = @transform_3, window_bounds = array<i64: 1, 2, 128>}]} {
    %c0_i32 = arith.constant 0 : i32
    %0 = arith.cmpi eq, %arg1, %c0_i32 : i32
    %1 = arith.extui %0 : i1 to i32
    %c0_i32_0 = arith.constant 0 : i32
    %2 = arith.cmpi ne, %1, %c0_i32_0 : i32
    scf.if %2 {
      %cst_14 = arith.constant 0.000000e+00 : f32
      %20 = vector.broadcast %cst_14 : f32 to vector<2x128xf32>
      %c0_15 = arith.constant 0 : index
      %c0_16 = arith.constant 0 : index
      %c0_17 = arith.constant 0 : index
      %21 = vector.load %arg5[%c0_15, %c0_16, %c0_17] : memref<1x2x128xf32, #tpu.memory_space<vmem>>, vector<1x2x128xf32>
      %22 = vector.shape_cast %21 : vector<1x2x128xf32> to vector<2x128xf32>
      %23 = vector.shape_cast %20 : vector<2x128xf32> to vector<1x2x128xf32>
      tpu.vector_store %arg5[%c0_15, %c0_16, %c0_17], %23 {strides = array<i32>} : memref<1x2x128xf32, #tpu.memory_space<vmem>>, vector<1x2x128xf32>,
    } else {
    }
    %c0 = arith.constant 0 : index
    %c0_1 = arith.constant 0 : index
    %3 = vector.load %arg2[%c0, %c0_1] : memref<32x1152xbf16, #tpu.memory_space<vmem>>, vector<32x1152xbf16>
    %c0_2 = arith.constant 0 : index
    %c0_3 = arith.constant 0 : index
    %4 = vector.load %arg3[%c0_2, %c0_3] : memref<1152x128xbf16, #tpu.memory_space<vmem>>, vector<1152x128xbf16>
    %cst = arith.constant dense<0.000000e+00> : vector<32x128xf32>
    %5 = tpu.matmul %3, %4, %cst {dimension_numbers = #tpu.dot_dimension_numbers<[1], [0], [0], [1], [0, 0, 1, 1], [], []>} : vector<32x1152xbf16>, vector<1152x128xbf16>, vector<32x128xf32> -> vector<32x128xf32>
    %cst_4 = arith.constant dense<0.000000e+00> : vector<128xf32>
    %6 = vector.multi_reduction <add>, %5, %cst_4 [0] : vector<32x128xf32> to vector<128xf32>
    %7 = vector.shape_cast %6 : vector<128xf32> to vector<1x128xf32>
    %8 = arith.mulf %5, %5 : vector<32x128xf32>
    %cst_5 = arith.constant dense<0.000000e+00> : vector<128xf32>
    %9 = vector.multi_reduction <add>, %8, %cst_5 [0] : vector<32x128xf32> to vector<128xf32>
    %10 = vector.shape_cast %9 : vector<128xf32> to vector<1x128xf32>
    %c0_6 = arith.constant 0 : index
    %c0_7 = arith.constant 0 : index
    %c0_8 = arith.constant 0 : index
    %11 = vector.load %arg5[%c0_6, %c0_7, %c0_8] : memref<1x2x128xf32, #tpu.memory_space<vmem>>, vector<1x2x128xf32>
    %12 = vector.shape_cast %11 : vector<1x2x128xf32> to vector<2x128xf32>
    %13 = tpu.concatenate %7, %10 in 0 : vector<1x128xf32>, vector<1x128xf32> -> vector<2x128xf32>
    %14 = arith.addf %12, %13 : vector<2x128xf32>
    %c0_9 = arith.constant 0 : index
    %c0_10 = arith.constant 0 : index
    %c0_11 = arith.constant 0 : index
    %15 = vector.load %arg5[%c0_9, %c0_10, %c0_11] : memref<1x2x128xf32, #tpu.memory_space<vmem>>, vector<1x2x128xf32>
    %16 = vector.shape_cast %15 : vector<1x2x128xf32> to vector<2x128xf32>
    %17 = vector.shape_cast %14 : vector<2x128xf32> to vector<1x2x128xf32>
    tpu.vector_store %arg5[%c0_9, %c0_10, %c0_11], %17 {strides = array<i32>} : memref<1x2x128xf32, #tpu.memory_space<vmem>>, vector<1x2x128xf32>,
    %18 = arith.truncf %5 : vector<32x128xf32> to vector<32x128xbf16>
    %c0_12 = arith.constant 0 : index
    %c0_13 = arith.constant 0 : index
    %19 = vector.load %arg4[%c0_12, %c0_13] : memref<32x128xbf16, #tpu.memory_space<vmem>>, vector<32x128xbf16>
    tpu.vector_store %arg4[%c0_12, %c0_13], %18 {strides = array<i32>} : memref<32x128xbf16, #tpu.memory_space<vmem>>, vector<32x128xbf16>,
    return
  }
  func.func @transform_0(%arg0: i32, %arg1: i32) -> (i32, i32) {
    %c1_i32 = arith.constant 1 : i32
    %0 = arith.muli %arg0, %c1_i32 : i32
    %1 = arith.addi %0, %arg1 : i32
    %c0_i32 = arith.constant 0 : i32
    %c0_i32_0 = arith.constant 0 : i32
    return %1, %c0_i32 : i32, i32
  }
  func.func @transform_1(%arg0: i32, %arg1: i32) -> (i32, i32) {
    %c0_i32 = arith.constant 0 : i32
    %c0_i32_0 = arith.constant 0 : i32
    %c0_i32_1 = arith.constant 0 : i32
    return %c0_i32, %c0_i32_0 : i32, i32
  }
  func.func @transform_2(%arg0: i32, %arg1: i32) -> (i32, i32) {
    %c1_i32 = arith.constant 1 : i32
    %0 = arith.muli %arg0, %c1_i32 : i32
    %1 = arith.addi %0, %arg1 : i32
    %c0_i32 = arith.constant 0 : i32
    %c0_i32_0 = arith.constant 0 : i32
    return %1, %c0_i32 : i32, i32
  }
  func.func @transform_3(%arg0: i32, %arg1: i32) -> (i32, i32, i32) {
    %c0_i32 = arith.constant 0 : i32
    %c0_i32_0 = arith.constant 0 : i32
    %c0_i32_1 = arith.constant 0 : i32
    return %arg0, %c0_i32, %c0_i32_0 : i32, i32, i32
  }
}

module attributes {stable_mosaic.version = 11 : i64} {
  func.func @_bn_sigmoid_kernel(%arg0: i32, %arg1: memref<64x128xbf16, #tpu.memory_space<vmem>>, %arg2: memref<1x128xf32, #tpu.memory_space<vmem>>, %arg3: memref<1x128xf32, #tpu.memory_space<vmem>>, %arg4: memref<64x128xf32, #tpu.memory_space<vmem>>) attributes {dimension_semantics = [#tpu.dimension_semantics<parallel>], iteration_bounds = array<i64: 1>, scalar_prefetch = 0 : i64, scratch_operands = 0 : i64, tpu.core_type = #tpu.core_type<tc>, window_params = [{transform_indices = @transform_0, window_bounds = array<i64: 64, 128>}, {pipeline_mode = #tpu.pipeline_mode<synchronous>, transform_indices = @transform_1, window_bounds = array<i64: 1, 128>}, {pipeline_mode = #tpu.pipeline_mode<synchronous>, transform_indices = @transform_2, window_bounds = array<i64: 1, 128>}, {transform_indices = @transform_3, window_bounds = array<i64: 64, 128>}]} {
    %c0 = arith.constant 0 : index
    %c0_0 = arith.constant 0 : index
    %0 = vector.load %arg1[%c0, %c0_0] : memref<64x128xbf16, #tpu.memory_space<vmem>>, vector<64x128xbf16>
    %1 = arith.extf %0 : vector<64x128xbf16> to vector<64x128xf32>
    %c0_1 = arith.constant 0 : index
    %c0_2 = arith.constant 0 : index
    %2 = vector.load %arg2[%c0_1, %c0_2] : memref<1x128xf32, #tpu.memory_space<vmem>>, vector<1x128xf32>
    %3 = vector.broadcast %2 : vector<1x128xf32> to vector<64x128xf32>
    %4 = arith.mulf %1, %3 : vector<64x128xf32>
    %c0_3 = arith.constant 0 : index
    %c0_4 = arith.constant 0 : index
    %5 = vector.load %arg3[%c0_3, %c0_4] : memref<1x128xf32, #tpu.memory_space<vmem>>, vector<1x128xf32>
    %6 = vector.broadcast %5 : vector<1x128xf32> to vector<64x128xf32>
    %7 = arith.addf %4, %6 : vector<64x128xf32>
    %cst = arith.constant 5.000000e-01 : f32
    %8 = vector.broadcast %cst : f32 to vector<64x128xf32>
    %9 = arith.mulf %8, %7 : vector<64x128xf32>
    %10 = math.tanh %9 : vector<64x128xf32>
    %cst_5 = arith.constant 5.000000e-01 : f32
    %11 = vector.broadcast %cst_5 : f32 to vector<64x128xf32>
    %12 = arith.mulf %11, %10 : vector<64x128xf32>
    %cst_6 = arith.constant 5.000000e-01 : f32
    %13 = vector.broadcast %cst_6 : f32 to vector<64x128xf32>
    %14 = arith.addf %12, %13 : vector<64x128xf32>
    %c0_7 = arith.constant 0 : index
    %c0_8 = arith.constant 0 : index
    %15 = vector.load %arg4[%c0_7, %c0_8] : memref<64x128xf32, #tpu.memory_space<vmem>>, vector<64x128xf32>
    tpu.vector_store %arg4[%c0_7, %c0_8], %14 {strides = array<i32>} : memref<64x128xf32, #tpu.memory_space<vmem>>, vector<64x128xf32>,
    return
  }
  func.func @transform_0(%arg0: i32) -> (i32, i32) {
    %c0_i32 = arith.constant 0 : i32
    %c0_i32_0 = arith.constant 0 : i32
    return %arg0, %c0_i32 : i32, i32
  }
  func.func @transform_1(%arg0: i32) -> (i32, i32) {
    %c0_i32 = arith.constant 0 : i32
    %c0_i32_0 = arith.constant 0 : i32
    %c0_i32_1 = arith.constant 0 : i32
    return %c0_i32, %c0_i32_0 : i32, i32
  }
  func.func @transform_2(%arg0: i32) -> (i32, i32) {
    %c0_i32 = arith.constant 0 : i32
    %c0_i32_0 = arith.constant 0 : i32
    %c0_i32_1 = arith.constant 0 : i32
    return %c0_i32, %c0_i32_0 : i32, i32
  }
  func.func @transform_3(%arg0: i32) -> (i32, i32) {
    %c0_i32 = arith.constant 0 : i32
    %c0_i32_0 = arith.constant 0 : i32
    return %arg0, %c0_i32 : i32, i32
  }
}

</mosaic_0001>

<bundles_post_ra>
// kernel: squeeze.4
= control target key start
LH: loop header
LB: loop body
LE: loop exit
PB: predicated region body
PF: predicated region fallthrough
CT: control target
= control target key end

     0   :  { %s130_s8 = smov 104   ;;  %s131_s9 = smov 112   ;;  %vm7_vm0 = vcmask 64512   ;;  %s221_s0 = inlined_call_operand.vmem [shape: f32[128], index: 0, kind: input, shape index: {}]   ;;  %s222_s1 = inlined_call_operand.vmem [shape: f32[16,8], index: 1, kind: output, shape index: {}]  }
   0x1   :  { %v4_v0 = vld [vmem:[%s221_s0] sm:$0x1]  ;;  %s129_s0 = smov 120   ;;  %s132_s10 = smov 96  }
   0x2   :  { %5 = vst [vmem:[#allocation0] sm:$0x1] %v4_v0  ;;  %s133_s11 = smov 88   ;;  %s134_s12 = smov 80  }
   0x3   :  { %s135_s13 = smov 72   ;;  %s136_s14 = smov 64  }
   0x4   :  { %s137_s17 = smov 56   ;;  %s138_s18 = smov 48  }
   0x5   :  { %s139_s19 = smov 40   ;;  %s140_s20 = smov 32  }
   0x6   :  { %s141_s21 = smov 24   ;;  %s142_s22 = smov 16  }
   0x7   :  { %s143_s23 = smov 8  }
   0x9   :  { %v9_v1 = vld [vmem:[#allocation0] sm:$0x1]  }
   0xa   :  { %v21_v2 = vld [vmem:[#allocation0] sm:$0x1]   ;;  %10 = vrot.lane.b32.xlu0 %v9_v1, %s129_s0 }
   0xb   :  { %22 = vrot.lane.b32.xlu1 %v21_v2, %s130_s8  ;;  %v15_v3 = vld [vmem:[#allocation0] sm:$0x1]  }
   0xc   :  { %v27_v4 = vld [vmem:[#allocation0] sm:$0x1]  }
   0xd   :  { %v33_v5 = vld [vmem:[#allocation0] sm:$0x1]  }
   0xe   :  { %16 = vrot.lane.b32.xlu0 %v15_v3, %s131_s9  ;;  %v39_v6 = vld [vmem:[#allocation0] sm:$0x1]  }
   0xf   :  { %28 = vrot.lane.b32.xlu1 %v27_v4, %s132_s10  ;;  %v45_v7 = vld [vmem:[#allocation0] sm:$0x1]  }
  0x10   :  { %v51_v8 = vld [vmem:[#allocation0] sm:$0x1]  }
  0x11   :  { %v57_v9 = vld [vmem:[#allocation0] sm:$0x1]  }
  0x12   :  { %34 = vrot.lane.b32.xlu0 %v33_v5, %s133_s11  ;;  %v63_v10 = vld [vmem:[#allocation0] sm:$0x1]  }
  0x13   :  { %40 = vrot.lane.b32.xlu1 %v39_v6, %s134_s12  ;;  %v6_v11 = vld [vmem:[#allocation0] sm:$0x1]  }
  0x14   :  { %8 = vst.msk [vmem:[%s222_s1] sm:$0x1] %vm7_vm0, %v6_v11   ;;  %v69_v12 = vld [vmem:[#allocation0] sm:$0x1]  }
  0x15   :  { %v75_v13 = vld [vmem:[#allocation0] sm:$0x1]  }
  0x16   :  { %46 = vrot.lane.b32.xlu0 %v45_v7, %s135_s13  ;;  %v81_v14 = vld [vmem:[#allocation0] sm:$0x1]  }
  0x17   :  { %52 = vrot.lane.b32.xlu1 %v51_v8, %s136_s14  ;;  %v87_v15 = vld [vmem:[#allocation0] sm:$0x1]  }
  0x18   :  { %v93_v16 = vld [vmem:[#allocation0] sm:$0x1]  }
  0x1a   :  { %58 = vrot.lane.b32.xlu0 %v57_v9, %s137_s17 }
  0x1b   :  { %64 = vrot.lane.b32.xlu1 %v63_v10, %s138_s18 }
  0x1e   :  { %70 = vrot.lane.b32.xlu0 %v69_v12, %s139_s19 }
  0x1f   :  { %76 = vrot.lane.b32.xlu1 %v75_v13, %s140_s20 }
  0x22   :  { %82 = vrot.lane.b32.xlu0 %v81_v14, %s141_s21 }
  0x23   :  { %88 = vrot.lane.b32.xlu1 %v87_v15, %s142_s22 }
  0x26   :  { %94 = vrot.lane.b32.xlu0 %v93_v16, %s143_s23 }
  0x7c   :  { %v11_v17 = vpop.permute.xlu0 %10  }
  0x7d   :  { %v23_v18 = vpop.permute.xlu1 %22   ;;  %99 = vst.msk [vmem:[%s222_s1 + $0x1] sm:$0x1] %vm7_vm0, %v11_v17  }
  0x7e   :  { %101 = vst.msk [vmem:[%s222_s1 + $0x3] sm:$0x1] %vm7_vm0, %v23_v18  }
  0x80   :  { %v17_v19 = vpop.permute.xlu0 %16  }
  0x81   :  { %v29_v20 = vpop.permute.xlu1 %28   ;;  %100 = vst.msk [vmem:[%s222_s1 + $0x2] sm:$0x1] %vm7_vm0, %v17_v19  }
  0x82   :  { %102 = vst.msk [vmem:[%s222_s1 + $0x4] sm:$0x1] %vm7_vm0, %v29_v20  }
  0x84   :  { %v35_v21 = vpop.permute.xlu0 %34  }
  0x85   :  { %v41_v22 = vpop.permute.xlu1 %40   ;;  %103 = vst.msk [vmem:[%s222_s1 + $0x5] sm:$0x1] %vm7_vm0, %v35_v21  }
  0x86   :  { %104 = vst.msk [vmem:[%s222_s1 + $0x6] sm:$0x1] %vm7_vm0, %v41_v22  }
  0x88   :  { %v47_v23 = vpop.permute.xlu0 %46  }
  0x89   :  { %v53_v24 = vpop.permute.xlu1 %52   ;;  %105 = vst.msk [vmem:[%s222_s1 + $0x7] sm:$0x1] %vm7_vm0, %v47_v23  }
  0x8a   :  { %106 = vst.msk [vmem:[%s222_s1 + $0x8] sm:$0x1] %vm7_vm0, %v53_v24  }
  0x8c   :  { %v59_v25 = vpop.permute.xlu0 %58  }
  0x8d   :  { %v65_v26 = vpop.permute.xlu1 %64   ;;  %107 = vst.msk [vmem:[%s222_s1 + $0x9] sm:$0x1] %vm7_vm0, %v59_v25  }
  0x8e   :  { %108 = vst.msk [vmem:[%s222_s1 + $0xa] sm:$0x1] %vm7_vm0, %v65_v26  }
  0x90   :  { %v71_v27 = vpop.permute.xlu0 %70  }
  0x91   :  { %v77_v28 = vpop.permute.xlu1 %76   ;;  %109 = vst.msk [vmem:[%s222_s1 + $0xb] sm:$0x1] %vm7_vm0, %v71_v27  }
  0x92   :  { %110 = vst.msk [vmem:[%s222_s1 + $0xc] sm:$0x1] %vm7_vm0, %v77_v28  }
  0x94   :  { %v83_v29 = vpop.permute.xlu0 %82  }
  0x95   :  { %v89_v30 = vpop.permute.xlu1 %88   ;;  %111 = vst.msk [vmem:[%s222_s1 + $0xd] sm:$0x1] %vm7_vm0, %v83_v29  }
  0x96   :  { %112 = vst.msk [vmem:[%s222_s1 + $0xe] sm:$0x1] %vm7_vm0, %v89_v30  }
  0x98   :  { %v95_v31 = vpop.permute.xlu0 %94  }
  0x99   :  { %113 = vst.msk [vmem:[%s222_s1 + $0xf] sm:$0x1] %vm7_vm0, %v95_v31  }

// kernel: tile.23
= control target key start
LH: loop header
LB: loop body
LE: loop exit
PB: predicated region body
PF: predicated region fallthrough
CT: control target
= control target key end

     0   :  { %s28_s0 = inlined_call_operand.vmem [shape: f32[8], index: 0, kind: input, shape index: {}]   ;;  %s29_s1 = inlined_call_operand.vmem [shape: f32[16,8], index: 1, kind: output, shape index: {}]  }
   0x1   :  { %v4_v0 = vld [vmem:[%s28_s0] ss:$0 sm:$0xff] }
   0x2   :  { %5 = vst [vmem:[%s29_s1] sm:$0xff] %v4_v0  ;;  %8 = vst [vmem:[%s29_s1 + $0x8] sm:$0xff] %v4_v0 }

// kernel: tile.24
= control target key start
LH: loop header
LB: loop body
LE: loop exit
PB: predicated region body
PF: predicated region fallthrough
CT: control target
= control target key end

     0   :  { %s131_s10 = smov 120   ;;  %s132_s11 = smov 104   ;;  %vm3_vm0 = vcmask 64512   ;;  %vm9_vm1 = vcmask 1048512   ;;  %vm15_vm2 = vcmask 982912   ;;  %vm21_vm3 = vcmask 917312   ;;  %s207_s0 = inlined_call_operand.vmem [shape: f32[16,8], index: 0, kind: input, shape index: {}]   ;;  %s208_s1 = inlined_call_operand.vmem [shape: f32[1,128], index: 1, kind: output, shape index: {}]  }
   0x1   :  { %v101_v0 = vld [vmem:[%s207_s0 + $0xf] sm:$0x1]   ;;  %v103_v1 = vld [vmem:[%s207_s0 + $0xd] sm:$0x1]   ;;  %v102_v2 = vld [vmem:[%s207_s0 + $0xe] sm:$0x1]  }
   0x2   :  { %7 = vrot.lane.b32.xlu0 %v101_v0, %s131_s10  ;;  %19 = vrot.lane.b32.xlu1 %v103_v1, %s132_s11  ;;  %v104_v3 = vld [vmem:[%s207_s0 + $0xc] sm:$0x1]   ;;  %s133_s16 = smov 112   ;;  %s134_s17 = smov 96   ;;  %v105_v4 = vld [vmem:[%s207_s0 + $0xb] sm:$0x1]  }
   0x3   :  { %v106_v5 = vld [vmem:[%s207_s0 + $0xa] sm:$0x1]   ;;  %v2_v6 = vld [vmem:[%s207_s0] sm:$0x1]   ;;  %s135_s24 = smov 88   ;;  %s136_s25 = smov 80  }
   0x4   :  { %4 = vst.msk [vmem:[#allocation0] sm:$0x1] %vm3_vm0, %v2_v6   ;;  %v107_v7 = vld [vmem:[%s207_s0 + $0x9] sm:$0x1]   ;;  %v108_v8 = vld [vmem:[%s207_s0 + $0x8] sm:$0x1]  }
   0x5   :  { %s137_s30 = smov 72   ;;  %s138_s2 = smov 64   ;;  %v109_v9 = vld [vmem:[%s207_s0 + $0x7] sm:$0x1]   ;;  %v110_v10 = vld [vmem:[%s207_s0 + $0x6] sm:$0x1]  }
   0x6   :  { %13 = vrot.lane.b32.xlu0 %v102_v2, %s133_s16  ;;  %25 = vrot.lane.b32.xlu1 %v104_v3, %s134_s17  ;;  %s139_s7 = smov 56   ;;  %s140_s8 = smov 48   ;;  %v111_v11 = vld [vmem:[%s207_s0 + $0x5] sm:$0x1]   ;;  %v112_v12 = vld [vmem:[%s207_s0 + $0x4] sm:$0x1]  }
   0x7   :  { %s141_s13 = smov 40   ;;  %s142_s14 = smov 32   ;;  %v113_v13 = vld [vmem:[%s207_s0 + $0x3] sm:$0x1]   ;;  %v114_v14 = vld [vmem:[%s207_s0 + $0x2] sm:$0x1]  }
   0x8   :  { %s143_s19 = smov 24   ;;  %s144_s20 = smov 16   ;;  %v115_v15 = vld [vmem:[%s207_s0 + $0x1] sm:$0x1]   ;;  %vm27_vm4 = vcmask 851712   ;;  %vm33_vm5 = vcmask 786112  }
   0x9   :  { %s145_s0 = smov 8   ;;  %vm39_vm6 = vcmask 720512   ;;  %vm45_vm7 = vcmask 654912   ;;  %vm51_vm8 = vcmask 589312   ;;  %vm57_vm9 = vcmask 523712  }
   0xa   :  { %31 = vrot.lane.b32.xlu0 %v105_v4, %s135_s24  ;;  %37 = vrot.lane.b32.xlu1 %v106_v5, %s136_s25  ;;  %vm63_vm10 = vcmask 458112   ;;  %vm69_vm11 = vcmask 392512   ;;  %vm75_vm12 = vcmask 326912   ;;  %vm81_vm13 = vcmask 261312  }
   0xb   :  { %vm87_vm14 = vcmask 195712   ;;  %vm93_vm15 = vcmask 130112  }
   0xe   :  { %43 = vrot.lane.b32.xlu0 %v107_v7, %s137_s30  ;;  %49 = vrot.lane.b32.xlu1 %v108_v8, %s138_s2 }
  0x12   :  { %55 = vrot.lane.b32.xlu0 %v109_v9, %s139_s7  ;;  %61 = vrot.lane.b32.xlu1 %v110_v10, %s140_s8 }
  0x16   :  { %67 = vrot.lane.b32.xlu0 %v111_v11, %s141_s13  ;;  %73 = vrot.lane.b32.xlu1 %v112_v12, %s142_s14 }
  0x1a   :  { %79 = vrot.lane.b32.xlu0 %v113_v13, %s143_s19  ;;  %85 = vrot.lane.b32.xlu1 %v114_v14, %s144_s20 }
  0x1e   :  { %91 = vrot.lane.b32.xlu0 %v115_v15, %s145_s0 }
  0x74   :  { %v8_v16 = vpop.permute.xlu0 %7   ;;  %v20_v17 = vpop.permute.xlu1 %19  }
  0x75   :  { %10 = vst.msk [vmem:[#allocation0] sm:$0x1] %vm9_vm1, %v8_v16  }
  0x78   :  { %v14_v18 = vpop.permute.xlu0 %13   ;;  %v26_v19 = vpop.permute.xlu1 %25  }
  0x79   :  { %16 = vst.msk [vmem:[#allocation0] sm:$0x1] %vm15_vm2, %v14_v18  }
  0x7a   :  { %22 = vst.msk [vmem:[#allocation0] sm:$0x1] %vm21_vm3, %v20_v17  }
  0x7b   :  { %28 = vst.msk [vmem:[#allocation0] sm:$0x1] %vm27_vm4, %v26_v19  }
  0x7c   :  { %v32_v20 = vpop.permute.xlu0 %31   ;;  %v38_v21 = vpop.permute.xlu1 %37  }
  0x7d   :  { %34 = vst.msk [vmem:[#allocation0] sm:$0x1] %vm33_vm5, %v32_v20  }
  0x7e   :  { %40 = vst.msk [vmem:[#allocation0] sm:$0x1] %vm39_vm6, %v38_v21  }
  0x80   :  { %v44_v22 = vpop.permute.xlu0 %43   ;;  %v50_v23 = vpop.permute.xlu1 %49  }
  0x81   :  { %46 = vst.msk [vmem:[#allocation0] sm:$0x1] %vm45_vm7, %v44_v22  }
  0x82   :  { %52 = vst.msk [vmem:[#allocation0] sm:$0x1] %vm51_vm8, %v50_v23  }
  0x84   :  { %v56_v24 = vpop.permute.xlu0 %55   ;;  %v62_v25 = vpop.permute.xlu1 %61  }
  0x85   :  { %58 = vst.msk [vmem:[#allocation0] sm:$0x1] %vm57_vm9, %v56_v24  }
  0x86   :  { %64 = vst.msk [vmem:[#allocation0] sm:$0x1] %vm63_vm10, %v62_v25  }
  0x88   :  { %v68_v26 = vpop.permute.xlu0 %67   ;;  %v74_v27 = vpop.permute.xlu1 %73  }
  0x89   :  { %70 = vst.msk [vmem:[#allocation0] sm:$0x1] %vm69_vm11, %v68_v26  }
  0x8a   :  { %76 = vst.msk [vmem:[#allocation0] sm:$0x1] %vm75_vm12, %v74_v27  }
  0x8c   :  { %v80_v28 = vpop.permute.xlu0 %79   ;;  %v86_v29 = vpop.permute.xlu1 %85  }
  0x8d   :  { %82 = vst.msk [vmem:[#allocation0] sm:$0x1] %vm81_vm13, %v80_v28  }
  0x8e   :  { %88 = vst.msk [vmem:[#allocation0] sm:$0x1] %vm87_vm14, %v86_v29  }
  0x90   :  { %v92_v30 = vpop.permute.xlu0 %91  }
  0x91   :  { %94 = vst.msk [vmem:[#allocation0] sm:$0x1] %vm93_vm15, %v92_v30  }
  0x98   :  { %v98_v31 = vld [vmem:[#allocation0] sm:$0x1] }
  0x99   :  { %100 = vst [vmem:[%s208_s1] sm:$0x1] %v98_v31 }

// kernel: conv_block_forward.5
= control target key start
LH: loop header
LB: loop body
LE: loop exit
PB: predicated region body
PF: predicated region fallthrough
CT: control target
= control target key end

     0   :  { %s262_s0 = inlined_call_operand.vmem [shape: bf16[64,128], index: 0, kind: input, shape index: {}]   ;;  %s263_s1 = inlined_call_operand.vmem [shape: f32[1,128], index: 1, kind: input, shape index: {}]   ;;  %s264_s2 = inlined_call_operand.vmem [shape: f32[1,128], index: 2, kind: input, shape index: {}]   ;;  %s265_s3 = inlined_call_operand.vmem [shape: bf16[64,128], index: 3, kind: output, shape index: {}]  }
   0x1   :  { %v155_v0 = vld [vmem:[%s262_s0] sm:$0xff]   ;;  %v190_v4 = vld [vmem:[%s262_s0 + $0x8] sm:$0xff]   ;;  %v191_v5 = vld [vmem:[%s262_s0 + $0x10] sm:$0xff]  }
   0x2   :  { %v136_v1 = vld [vmem:[%s263_s1] ss:$0 sm:$0xff]  ;;  %v156_v2 = vunpack.c.l.bf16 %v155_v0  ;;  %v157_v3 = vunpack.c.h.bf16 %v155_v0  ;;  %v192_v6 = vld [vmem:[%s262_s0 + $0x18] sm:$0xff]   ;;  %v160_v8 = vunpack.c.l.bf16 %v190_v4  ;;  %v161_v9 = vunpack.c.h.bf16 %v190_v4 }
   0x3   :  { %v137_v7 = vld [vmem:[%s264_s2] ss:$0 sm:$0xff]  ;;  %v164_v10 = vunpack.c.l.bf16 %v191_v5  ;;  %v165_v11 = vunpack.c.h.bf16 %v191_v5  ;;  %v168_v14 = vunpack.c.l.bf16 %v192_v6  ;;  %v169_v15 = vunpack.c.h.bf16 %v192_v6 }
   0x4   :  { %v37_v12 = vmul.f32 %v156_v2, %v136_v1  ;;  %v38_v13 = vmul.f32 %v157_v3, %v136_v1  ;;  %v39_v16 = vmul.f32 %v160_v8, %v136_v1  ;;  %v40_v17 = vmul.f32 %v161_v9, %v136_v1 }
   0x5   :  { %v41_v18 = vmul.f32 %v164_v10, %v136_v1  ;;  %v42_v19 = vmul.f32 %v165_v11, %v136_v1  ;;  %v43_v22 = vmul.f32 %v168_v14, %v136_v1  ;;  %v44_v23 = vmul.f32 %v169_v15, %v136_v1 }
   0x6   :  { %v52_v20 = vadd.f32 %v137_v7, %v37_v12  ;;  %v53_v21 = vadd.f32 %v137_v7, %v38_v13  ;;  %v54_v24 = vadd.f32 %v137_v7, %v39_v16  ;;  %v55_v25 = vadd.f32 %v137_v7, %v40_v17 }
   0x7   :  { %v56_v26 = vadd.f32 %v137_v7, %v41_v18  ;;  %v57_v27 = vadd.f32 %v137_v7, %v42_v19  ;;  %v58_v30 = vadd.f32 %v137_v7, %v43_v22  ;;  %v59_v33 = vadd.f32 %v137_v7, %v44_v23 }
   0x8   :  { %v60_v28 = vmul.f32 0.5, %v52_v20  ;;  %v61_v29 = vmul.f32 0.5, %v53_v21  ;;  %v62_v31 = vmul.f32 0.5, %v54_v24  ;;  %v63_v32 = vmul.f32 0.5, %v55_v25 }
   0x9   :  { %v64_v34 = vmul.f32 0.5, %v56_v26  ;;  %v65_v35 = vmul.f32 0.5, %v57_v27  ;;  %v66_v36 = vmul.f32 0.5, %v58_v30  ;;  %v67_v37 = vmul.f32 0.5, %v59_v33 }
   0xa   :  { %196 = vtanh.f32 %v60_v28 }
   0xb   :  { %198 = vtanh.f32 %v61_v29 }
   0xc   :  { %200 = vtanh.f32 %v62_v31 }
   0xd   :  { %202 = vtanh.f32 %v63_v32 }
   0xe   :  { %204 = vtanh.f32 %v64_v34 }
   0xf   :  { %206 = vtanh.f32 %v65_v35 }
  0x10   :  { %208 = vtanh.f32 %v66_v36 }
  0x11   :  { %210 = vtanh.f32 %v67_v37 }
  0x14   :  { %v197_v38 = vpop.eup %196 }
  0x15   :  { %v199_v39 = vpop.eup %198  ;;  %v76_v40 = vmul.f32 0.5, %v197_v38 }
  0x16   :  { %v201_v41 = vpop.eup %200  ;;  %v77_v42 = vmul.f32 0.5, %v199_v39 }
  0x17   :  { %v203_v43 = vpop.eup %202  ;;  %v84_v44 = vadd.f32 0.5, %v76_v40  ;;  %v78_v45 = vmul.f32 0.5, %v201_v41 }
  0x18   :  { %v205_v46 = vpop.eup %204  ;;  %v85_v47 = vadd.f32 0.5, %v77_v42  ;;  %v79_v48 = vmul.f32 0.5, %v203_v43 }
  0x19   :  { %v207_v49 = vpop.eup %206  ;;  %v86_v50 = vadd.f32 0.5, %v78_v45  ;;  %v80_v51 = vmul.f32 0.5, %v205_v46 }
  0x1a   :  { %v209_v52 = vpop.eup %208  ;;  %v173_v53 = vpack.c.bf16 %v85_v47, %v84_v44  ;;  %v87_v54 = vadd.f32 0.5, %v79_v48  ;;  %v81_v55 = vmul.f32 0.5, %v207_v49 }
  0x1b   :  { %v211_v56 = vpop.eup %210  ;;  %v88_v57 = vadd.f32 0.5, %v80_v51  ;;  %v82_v58 = vmul.f32 0.5, %v209_v52 }
  0x1c   :  { %174 = vst [vmem:[%s265_s3] sm:$0xff] %v173_v53   ;;  %v178_v59 = vpack.c.bf16 %v87_v54, %v86_v50  ;;  %v89_v60 = vadd.f32 0.5, %v81_v55  ;;  %v83_v61 = vmul.f32 0.5, %v211_v56 }
  0x1d   :  { %v90_v62 = vadd.f32 0.5, %v82_v58 }
  0x1e   :  { %193 = vst [vmem:[%s265_s3 + $0x8] sm:$0xff] %v178_v59   ;;  %v183_v63 = vpack.c.bf16 %v89_v60, %v88_v57  ;;  %v91_v0 = vadd.f32 0.5, %v83_v61 }
  0x20   :  { %194 = vst [vmem:[%s265_s3 + $0x10] sm:$0xff] %v183_v63   ;;  %v188_v1 = vpack.c.bf16 %v91_v0, %v90_v62 }
  0x22   :  { %195 = vst [vmem:[%s265_s3 + $0x18] sm:$0xff] %v188_v1  }

// kernel: conv_block_forward.4
= control target key start
LH: loop header
LB: loop body
LE: loop exit
PB: predicated region body
PF: predicated region fallthrough
CT: control target
= control target key end

     0   :  { %s1142_s12 = smov 0   ;;  %s1144_s13 = smov 0   ;;  %s1312_s0 = inlined_call_operand.vmem [shape: bf16[64,576], index: 0, kind: input, shape index: {}]   ;;  %s1313_s1 = inlined_call_operand.vmem [shape: bf16[576,128], index: 1, kind: input, shape index: {}]   ;;  %s1314_s2 = inlined_call_operand.vmem [shape: bf16[64,128], index: 2, kind: output, shape index: {0}]   ;;  %s1315_s3 = inlined_call_operand.vmem [shape: f32[2,2,128], index: 3, kind: output, shape index: {1}]  }
   0x1   :  { %s1146_s14 = smov 0  }
   0x2 LB: > { %s26_s15 = sadd.s32 1, %s1115_s13  ;;  %p872_p0 = scmp.ge.s32.totalorder %s1119_s14, 1  ;;  %s1119_s14 = sphi %s1146_s14, %s14_s14   ;;  %s1115_s13 = sphi %s1144_s13, %s1317_s13   ;;  %s1111_s12 = sphi %s1142_s12, %s1316_s12  }
   0x3   : > { %p28_p1 = scmp.ge.s32.totalorder %s26_s15, 2  ;;  %p160_p2 = scmp.lt.s32.totalorder %s1119_s14, 3 }
   0x5   : > { %s1319_s15 = smov (%p28_p1, %s26_s15), 0  ;;  %p161_p3 = pnand %p872_p0, %p160_p2 }
   0x6   : > { %v1047_v0 = vld [vmem:[%s1313_s1 + $0x40] sm:$0xff] (!%p161_p3)   ;;  %v1051_v4 = vld [vmem:[%s1313_s1 + $0x48] sm:$0xff] (!%p161_p3)   ;;  %v1055_v8 = vld [vmem:[%s1313_s1 + $0x50] sm:$0xff] (!%p161_p3)   ;;  %s873_s23 = sshll.u32 (!%p161_p3), %s1111_s12, 2  ;;  %vm568_vm0 = vcmask (!%p161_p3), 523264   ;;  %p208_p5 = scmp.lt.s32.totalorder (!%p161_p3), %s1111_s12, 1 }
   0x7   : > { %164 = sbr.rel (%p161_p3) target bundleno = 298 (0x12a), region = 28  ;;  %v1048_v1 = vld [vmem:[%s1313_s1 + $0xc0] sm:$0xff] (!%p161_p3)   ;;  %947 = vmatprep.subr.bf16.mxu0 (!%p161_p3), %v1047_v0  ;;  %v1052_v5 = vld [vmem:[%s1313_s1 + $0xc8] sm:$0xff] (!%p161_p3)   ;;  %v1056_v9 = vld [vmem:[%s1313_s1 + $0xd0] sm:$0xff] (!%p161_p3)   ;;  %p193_p4 = scmp.lt.s32.totalorder (!%p161_p3), %s873_s23, 7  ;;  %v1121_v46 = vmov (!%p161_p3), 0.0  }
   0x8   : > { %v1049_v2 = vld [vmem:[%s1313_s1] sm:$0xff] (!%p161_p3)   ;;  %975 = vmatprep.subr.bf16.mxu1 (!%p161_p3), %v1048_v1  ;;  %v1053_v6 = vld [vmem:[%s1313_s1 + $0x8] sm:$0xff] (!%p161_p3)   ;;  %v1057_v10 = vld [vmem:[%s1313_s1 + $0x10] sm:$0xff] (!%p161_p3)   ;;  %vm745_vm1 = vcmask (!%p161_p3), 1040384  }
   0x9   : > { %v1050_v3 = vld [vmem:[%s1313_s1 + $0x80] sm:$0xff] (!%p161_p3)   ;;  %948 = vmatpush3.bf16.msra.mxu0 (!%p161_p3), %v1049_v2  ;;  %v1054_v7 = vld [vmem:[%s1313_s1 + $0x88] sm:$0xff] (!%p161_p3)   ;;  %v1058_v11 = vld [vmem:[%s1313_s1 + $0x90] sm:$0xff] (!%p161_p3)  }
   0xa   : > { %976 = vmatpush3.bf16.msra.mxu1 (!%p161_p3), %v1050_v3  ;;  %949 = vmatprep.subr.bf16.mxu0 (!%p161_p3), %v1051_v4  ;;  %v1059_v12 = vld [vmem:[%s1313_s1 + $0x58] sm:$0xff] (!%p161_p3)   ;;  %v1063_v16 = vld [vmem:[%s1313_s1 + $0x60] sm:$0xff] (!%p161_p3)   ;;  %v1067_v20 = vld [vmem:[%s1313_s1 + $0x68] sm:$0xff] (!%p161_p3)  }
   0xb   : > { %977 = vmatprep.subr.bf16.mxu1 (!%p161_p3), %v1052_v5  ;;  %v1060_v13 = vld [vmem:[%s1313_s1 + $0xd8] sm:$0xff] (!%p161_p3)   ;;  %v1064_v17 = vld [vmem:[%s1313_s1 + $0xe0] sm:$0xff] (!%p161_p3)   ;;  %v1068_v21 = vld [vmem:[%s1313_s1 + $0xe8] sm:$0xff] (!%p161_p3)  }
   0xc   : > { %v1061_v14 = vld [vmem:[%s1313_s1 + $0x18] sm:$0xff] (!%p161_p3)   ;;  %v1065_v18 = vld [vmem:[%s1313_s1 + $0x20] sm:$0xff] (!%p161_p3)   ;;  %v1069_v22 = vld [vmem:[%s1313_s1 + $0x28] sm:$0xff] (!%p161_p3)  }
   0xd   : > { %950 = vmatpush3.bf16.msra.mxu0 (!%p161_p3), %v1053_v6  ;;  %v1062_v15 = vld [vmem:[%s1313_s1 + $0x98] sm:$0xff] (!%p161_p3)   ;;  %v1066_v19 = vld [vmem:[%s1313_s1 + $0xa0] sm:$0xff] (!%p161_p3)   ;;  %v1070_v23 = vld [vmem:[%s1313_s1 + $0xa8] sm:$0xff] (!%p161_p3)  }
   0xe   : > { %978 = vmatpush3.bf16.msra.mxu1 %v1054_v7  ;;  %951 = vmatprep.subr.bf16.mxu0 %v1055_v8  ;;  %s1321_s23 = smov (!%p193_p4, %s873_s23), 7  ;;  %v1071_v24 = vld [vmem:[%s1313_s1 + $0x70] sm:$0xff]   ;;  %v1075_v28 = vld [vmem:[%s1313_s1 + $0x78] sm:$0xff]   ;;  %v1085_v36 = vld [vmem:[%s1313_s1 + $0x100] sm:$0xff]   ;;  %s1323_s12 = smov (!%p208_p5, %s1111_s12), 1 }
   0xf   : > { %979 = vmatprep.subr.bf16.mxu1 %v1056_v9  ;;  %v1072_v25 = vld [vmem:[%s1313_s1 + $0xf0] sm:$0xff]   ;;  %s1021_s24 = smul.u32 20, %s1321_s23  ;;  %v1076_v29 = vld [vmem:[%s1313_s1 + $0xf8] sm:$0xff]   ;;  %v1086_v37 = vld [vmem:[%s1313_s1 + $0x108] sm:$0xff]   ;;  %s877_s26 = sshll.u32 %s1323_s12, 1 }
  0x10   : > { %v1073_v26 = vld [vmem:[%s1313_s1 + $0x30] sm:$0xff]   ;;  %v1077_v30 = vld [vmem:[%s1313_s1 + $0x38] sm:$0xff]   ;;  %s1294_s29 = scalar_lea.vmem %s1315_s3, %s877_s26  ;;  %s876_s12 = sshll.u32 %s1321_s23, 2 }
  0x11   : > { %952 = vmatpush3.bf16.msra.mxu0 %v1057_v10  ;;  %v1074_v27 = vld [vmem:[%s1313_s1 + $0xb0] sm:$0xff]   ;;  %s1259_s8 = scalar_lea.vmem %s1312_s0, %s1021_s24  ;;  %v1078_v31 = vld [vmem:[%s1313_s1 + $0xb8] sm:$0xff]   ;;  %217 = vst [vmem:[%s1294_s29] sm:$0x3] %v1121_v46  ;;  %s205_s5 = scalar_lea.vmem %s1314_s2, %s876_s12 }
  0x12   : > { %980 = vmatpush3.bf16.msra.mxu1 %v1058_v11  ;;  %953 = vmatprep.subr.bf16.mxu0 %v1059_v12  ;;  %v1079_v32 = vld [vmem:[%s1259_s8] ss:$20 sps:$4 sm:$0xff]   ;;  %v1081_v33 = vld [vmem:[%s1259_s8 + $0x4] ss:$20 sps:$4 sm:$0xff]   ;;  %v1082_v34 = vld [vmem:[%s1259_s8 + $0x8] ss:$20 sps:$4 sm:$0xff]  }
  0x13   : > { %981 = vmatprep.subr.bf16.mxu1 %v1060_v13  ;;  %v1084_v35 = vld [vmem:[%s1259_s8 + $0xc] ss:$20 sps:$4 sm:$0xff]   ;;  %607 = vmatprep.mubr.bf16.mxu0 %v1081_v33  ;;  %v1089_v39 = vld [vmem:[%s1259_s8 + $0x34] ss:$20 sps:$4 sm:$0xff]   ;;  %v1092_v42 = vld [vmem:[%s1259_s8 + $0x30] ss:$20 sps:$4 sm:$0xff]  }
  0x14   : > { %656 = vmatprep.mubr.bf16.mxu1 %v1084_v35  ;;  %v1087_v38 = vld [vmem:[%s1259_s8 + $0x2c] ss:$20 sps:$4 sm:$0xff]   ;;  %v1091_v40 = vld [vmem:[%s1259_s8 + $0x28] ss:$20 sps:$4 sm:$0xff]   ;;  %v1093_v41 = vld [vmem:[%s1313_s1 + $0x110] sm:$0xff]  }
  0x15   : > { %954 = vmatpush3.bf16.msra.mxu0 %v1061_v14  ;;  %v1095_v43 = vld [vmem:[%s1259_s8 + $0x10] ss:$20 sps:$4 sm:$0xff]   ;;  %v1094_v44 = vld [vmem:[%s1313_s1 + $0x118] sm:$0xff]  }
  0x16   : > { %982 = vmatpush3.bf16.msra.mxu1 %v1062_v15  ;;  %955 = vmatprep.subr.bf16.mxu0 %v1063_v16  ;;  %v1096_v45 = vld [vmem:[%s1259_s8 + $0x38] ss:$20 sps:$4 sm:$0xff]  }
  0x17   : > { %983 = vmatprep.subr.bf16.mxu1 %v1064_v17 }
  0x19   : > { %956 = vmatpush3.bf16.msra.mxu0 %v1065_v18 }
  0x1a   : > { %984 = vmatpush3.bf16.msra.mxu1 %v1066_v19  ;;  %957 = vmatprep.subr.bf16.mxu0 %v1067_v20 }
  0x1b   : > { %985 = vmatprep.subr.bf16.mxu1 %v1068_v21 }
  0x1d   : > { %958 = vmatpush3.bf16.msra.mxu0 %v1069_v22 }
  0x1e   : > { %986 = vmatpush3.bf16.msra.mxu1 %v1070_v23  ;;  %959 = vmatprep.subr.bf16.mxu0 %v1071_v24 }
  0x1f   : > { %987 = vmatprep.subr.bf16.mxu1 %v1072_v25 }
  0x21   : > { %960 = vmatpush3.bf16.msra.mxu0 %v1073_v26 }
  0x22   : > { %988 = vmatpush3.bf16.msra.mxu1 %v1074_v27  ;;  %961 = vmatprep.subr.bf16.mxu0 %v1075_v28 }
  0x23   : > { %989 = vmatprep.subr.bf16.mxu1 %v1076_v29 }
  0x25   : > { %962 = vmatpush3.bf16.msra.mxu0 %v1077_v30 }
  0x26   : > { %990 = vmatpush3.bf16.msra.mxu1 %v1078_v31  ;;  %1009 = vmatprep.subr.bf16.mxu0 %v1085_v36 }
  0x28   : > { %608 = vmatmul.mubr.bf16.vlgmr.msra.gmra.mrb[0].mxu0 %v1079_v32 }
  0x29   : > { %657 = vmatmul.mubr.bf16.vlgmr.msra.gmra.mrb[0].mxu1 %v1082_v34  ;;  %1010 = vmatpush3.bf16.msra.mxu0 %v1085_v36 }
  0x2a   : > { %1011 = vmatprep.subr.bf16.mxu0 %v1086_v37  ;;  %615 = vmatprep.mubr.bf16.mxu0 %v1087_v38 }
  0x2b   : > { %664 = vmatprep.mubr.bf16.mxu1 %v1089_v39 }
  0x2d   : > { %1012 = vmatpush3.bf16.msra.mxu0 %v1086_v37 }
  0x2e   : > { %1013 = vmatprep.subr.bf16.mxu0 %v1093_v41 }
  0x30   : > { %616 = vmatmul.mubr.bf16.gmra.mrb[4].mxu0 %v1091_v40 }
  0x31   : > { %665 = vmatmul.mubr.bf16.gmra.mrb[4].mxu1 %v1092_v42  ;;  %1017 = vmatprep.mubr.msk.bf16.mxu0 %vm568_vm0, %v1095_v43  ;;  %v744_v43 = vld [vmem:[%s1294_s29] sm:$0x3] }
  0x32   : > { %1014 = vmatpush3.bf16.msra.mxu0 %v1093_v41 }
  0x33   : > { %1015 = vmatprep.subr.bf16.mxu0 %v1094_v44 }
  0x36   : > { %1016 = vmatpush3.bf16.msra.mxu0 %v1094_v44 }
  0x39   : > { %1018 = vmatmul.mubr.msk.bf16.vlgmr.msra.gmra.mrb[8].mxu0 %vm568_vm0, %v1096_v45 }
  0xfb   : > { %v963_v47 = vpop.f32.mrb[0].mxu0 }
  0xfc   : > { %v991_v48 = vpop.f32.mrb[0].mxu1  ;;  %v964_v49 = vpop.f32.mrb[1].mxu0 }
  0xfd   : > { %v965_v50 = vadd.f32 %v964_v49, %v963_v47  ;;  %v992_v51 = vpop.f32.mrb[1].mxu1  ;;  %v966_v52 = vpop.f32.mrb[2].mxu0 }
  0xfe   : > { %v993_v53 = vadd.f32 %v992_v51, %v991_v48  ;;  %v994_v54 = vpop.f32.mrb[2].mxu1  ;;  %v967_v55 = vpop.f32.mrb[3].mxu0 }
  0xff   : > { %v968_v56 = vadd.f32 %v967_v55, %v966_v52  ;;  %v995_v57 = vpop.f32.mrb[3].mxu1 }
 0x100   : > { %v996_v58 = vadd.f32 %v995_v57, %v994_v54  ;;  %v659_v59 = vadd.f32 %v993_v53, %v965_v50 }
 0x102   : > { %v662_v60 = vadd.f32 %v996_v58, %v968_v56 }
 0x103   : > { %v969_v61 = vpop.f32.mrb[4].mxu0 }
 0x104   : > { %v997_v62 = vpop.f32.mrb[4].mxu1  ;;  %v970_v63 = vpop.f32.mrb[5].mxu0 }
 0x105   : > { %v971_v0 = vadd.f32 %v970_v63, %v969_v61  ;;  %v998_v1 = vpop.f32.mrb[5].mxu1  ;;  %v972_v2 = vpop.f32.mrb[6].mxu0 }
 0x106   : > { %v999_v3 = vadd.f32 %v998_v1, %v997_v62  ;;  %v1000_v4 = vpop.f32.mrb[6].mxu1  ;;  %v973_v5 = vpop.f32.mrb[7].mxu0 }
 0x107   : > { %v974_v6 = vadd.f32 %v973_v5, %v972_v2  ;;  %v1001_v7 = vpop.f32.mrb[7].mxu1 }
 0x108   : > { %v1002_v8 = vadd.f32 %v1001_v7, %v1000_v4  ;;  %v667_v9 = vadd.f32 %v999_v3, %v971_v0 }
 0x10a   : > { %v670_v10 = vadd.f32 %v1002_v8, %v974_v6 }
 0x10c   : > { %v1019_v11 = vpop.f32.mrb[8].mxu0 }
 0x10d   : > { %v716_v12 = vadd.f32 %v1019_v11, %v667_v9  ;;  %v707_v13 = vpop.f32.mrb[9].mxu0 }
 0x10e   : > { %v708_v14 = vadd.f32 %v707_v13, %v659_v59  ;;  %v1020_v15 = vpop.f32.mrb[10].mxu0 }
 0x10f   : > { %v719_v16 = vadd.f32 %v1020_v15, %v670_v10  ;;  %v710_v17 = vpop.f32.mrb[11].mxu0  ;;  %v733_v24 = vmul.f32 %v716_v12, %v716_v12 }
 0x110   : > { %v711_v18 = vadd.f32 %v710_v17, %v662_v60  ;;  %v731_v20 = vmul.f32 %v708_v14, %v708_v14 }
 0x111   : > { %v944_v19 = vpack.c.bf16 %v719_v16, %v716_v12  ;;  %v734_v27 = vmul.f32 %v719_v16, %v719_v16 }
 0x112   : > { %v722_v21 = vadd.f32 %v711_v18, %v708_v14  ;;  %v732_v22 = vmul.f32 %v711_v18, %v711_v18  ;;  %v939_v23 = vpack.c.bf16 %v711_v18, %v708_v14 }
 0x113   : > { %946 = vst [vmem:[%s205_s5 + $0x8] sm:$0xff] %v944_v19  }
 0x114   : > { %v723_v25 = vadd.f32 %v722_v21, %v716_v12  ;;  %v735_v26 = vadd.f32 %v732_v22, %v731_v20  ;;  %940 = vst [vmem:[%s205_s5] sm:$0xff] %v939_v23  }
 0x116   : > { %v724_v28 = vadd.f32 %v723_v25, %v719_v16  ;;  %v736_v29 = vadd.f32 %v735_v26, %v733_v24 }
 0x118   : > { %v725_v30 = vrot.slane %v724_v28, 4  ;;  %v737_v31 = vadd.f32 %v736_v29, %v734_v27 }
 0x11a   : > { %v726_v32 = vadd.f32 %v725_v30, %v724_v28  ;;  %v738_v33 = vrot.slane %v737_v31, 4 }
 0x11c   : > { %v727_v34 = vrot.slane %v726_v32, 2  ;;  %v739_v35 = vadd.f32 %v738_v33, %v737_v31 }
 0x11e   : > { %v728_v36 = vadd.f32 %v727_v34, %v726_v32  ;;  %v740_v37 = vrot.slane %v739_v35, 2 }
 0x120   : > { %v729_v38 = vrot.slane %v728_v36, 1  ;;  %v741_v39 = vadd.f32 %v740_v37, %v739_v35 }
 0x122   : > { %v742_v40 = vrot.slane %v741_v39, 1  ;;  %v730_v41 = vadd.f32 %v729_v38, %v728_v36 }
 0x124   : > { %v743_v42 = vadd.f32 %v742_v40, %v741_v39 }
 0x126   : > { %v746_v44 = vsel %vm745_vm1, %v730_v41, %v743_v42 }
 0x127   : > { %v747_v45 = vadd.f32 %v746_v44, %v744_v43 }
 0x129   : > { %748 = vst [vmem:[%s1294_s29] sm:$0x3] %v747_v45 }
 0x12a PF: > { %s14_s14 = sadd.s32 1, %s1119_s14   ;;  %s1316_s12 = smov %s1115_s13 }
 0x12b   : > { %p11_p6 = scmp.ge.s32.totalorder %s14_s14, 4   ;;  %s1317_s13 = smov %s1319_s15 }
 0x12d   :  { %13 = sbr.rel (!%p11_p6) target bundleno = 2 (0x2), region = 74 }

// kernel: conv_block_forward.6
= control target key start
LH: loop header
LB: loop body
LE: loop exit
PB: predicated region body
PF: predicated region fallthrough
CT: control target
= control target key end

     0   :  { %s1729_s12 = smov 0   ;;  %s1731_s13 = smov 0   ;;  %s2015_s0 = inlined_call_operand.vmem [shape: bf16[64,1152], index: 0, kind: input, shape index: {}]   ;;  %s2016_s1 = inlined_call_operand.vmem [shape: bf16[1152,128], index: 1, kind: input, shape index: {}]   ;;  %s2017_s2 = inlined_call_operand.vmem [shape: bf16[64,128], index: 2, kind: output, shape index: {0}]   ;;  %s2018_s3 = inlined_call_operand.vmem [shape: f32[2,2,128], index: 3, kind: output, shape index: {1}]  }
   0x1   :  { %s1733_s14 = smov 0  }
   0x2 LB: > { %s26_s15 = sadd.s32 1, %s1702_s13  ;;  %p1301_p0 = scmp.ge.s32.totalorder %s1706_s14, 1  ;;  %s1706_s14 = sphi %s1733_s14, %s14_s14   ;;  %s1702_s13 = sphi %s1731_s13, %s2020_s13   ;;  %s1698_s12 = sphi %s1729_s12, %s2019_s12  }
   0x3   : > { %p28_p1 = scmp.ge.s32.totalorder %s26_s15, 2  ;;  %p160_p2 = scmp.lt.s32.totalorder %s1706_s14, 3 }
   0x5   : > { %s2022_s15 = smov (%p28_p1, %s26_s15), 0  ;;  %p161_p3 = pnand %p1301_p0, %p160_p2 }
   0x6   : > { %v1586_v0 = vld [vmem:[%s2016_s1 + $0x40] sm:$0xff] (!%p161_p3)   ;;  %v1590_v4 = vld [vmem:[%s2016_s1 + $0x48] sm:$0xff] (!%p161_p3)   ;;  %v1594_v8 = vld [vmem:[%s2016_s1 + $0x50] sm:$0xff] (!%p161_p3)   ;;  %s1302_s23 = sshll.u32 (!%p161_p3), %s1698_s12, 2  ;;  %p208_p5 = scmp.lt.s32.totalorder (!%p161_p3), %s1698_s12, 1  ;;  %vm1174_vm0 = vcmask (!%p161_p3), 1040384  }
   0x7   : > { %164 = sbr.rel (%p161_p3) target bundleno = 345 (0x159), region = 28  ;;  %v1587_v1 = vld [vmem:[%s2016_s1 + $0xc0] sm:$0xff] (!%p161_p3)   ;;  %1418 = vmatprep.subr.bf16.mxu0 (!%p161_p3), %v1586_v0  ;;  %v1591_v5 = vld [vmem:[%s2016_s1 + $0xc8] sm:$0xff] (!%p161_p3)   ;;  %v1595_v9 = vld [vmem:[%s2016_s1 + $0xd0] sm:$0xff] (!%p161_p3)   ;;  %p193_p4 = scmp.lt.s32.totalorder (!%p161_p3), %s1302_s23, 7 }
   0x8   : > { %v1588_v2 = vld [vmem:[%s2016_s1] sm:$0xff] (!%p161_p3)   ;;  %1446 = vmatprep.subr.bf16.mxu1 (!%p161_p3), %v1587_v1  ;;  %v1592_v6 = vld [vmem:[%s2016_s1 + $0x8] sm:$0xff] (!%p161_p3)   ;;  %v1596_v10 = vld [vmem:[%s2016_s1 + $0x10] sm:$0xff] (!%p161_p3)  }
   0x9   : > { %v1589_v3 = vld [vmem:[%s2016_s1 + $0x80] sm:$0xff] (!%p161_p3)   ;;  %1419 = vmatpush3.bf16.msra.mxu0 (!%p161_p3), %v1588_v2  ;;  %v1593_v7 = vld [vmem:[%s2016_s1 + $0x88] sm:$0xff] (!%p161_p3)   ;;  %v1597_v11 = vld [vmem:[%s2016_s1 + $0x90] sm:$0xff] (!%p161_p3)  }
   0xa   : > { %1447 = vmatpush3.bf16.msra.mxu1 (!%p161_p3), %v1589_v3  ;;  %1420 = vmatprep.subr.bf16.mxu0 (!%p161_p3), %v1590_v4  ;;  %v1598_v12 = vld [vmem:[%s2016_s1 + $0x58] sm:$0xff] (!%p161_p3)   ;;  %v1602_v16 = vld [vmem:[%s2016_s1 + $0x60] sm:$0xff] (!%p161_p3)   ;;  %v1606_v20 = vld [vmem:[%s2016_s1 + $0x68] sm:$0xff] (!%p161_p3)  }
   0xb   : > { %1448 = vmatprep.subr.bf16.mxu1 (!%p161_p3), %v1591_v5  ;;  %v1599_v13 = vld [vmem:[%s2016_s1 + $0xd8] sm:$0xff] (!%p161_p3)   ;;  %v1603_v17 = vld [vmem:[%s2016_s1 + $0xe0] sm:$0xff] (!%p161_p3)   ;;  %v1607_v21 = vld [vmem:[%s2016_s1 + $0xe8] sm:$0xff] (!%p161_p3)  }
   0xc   : > { %v1600_v14 = vld [vmem:[%s2016_s1 + $0x18] sm:$0xff] (!%p161_p3)   ;;  %v1604_v18 = vld [vmem:[%s2016_s1 + $0x20] sm:$0xff] (!%p161_p3)   ;;  %v1608_v22 = vld [vmem:[%s2016_s1 + $0x28] sm:$0xff] (!%p161_p3)  }
   0xd   : > { %1421 = vmatpush3.bf16.msra.mxu0 (!%p161_p3), %v1592_v6  ;;  %v1601_v15 = vld [vmem:[%s2016_s1 + $0x98] sm:$0xff] (!%p161_p3)   ;;  %v1605_v19 = vld [vmem:[%s2016_s1 + $0xa0] sm:$0xff] (!%p161_p3)   ;;  %v1609_v23 = vld [vmem:[%s2016_s1 + $0xa8] sm:$0xff] (!%p161_p3)  }
   0xe   : > { %1449 = vmatpush3.bf16.msra.mxu1 %v1593_v7  ;;  %1422 = vmatprep.subr.bf16.mxu0 %v1594_v8  ;;  %s2024_s23 = smov (!%p193_p4, %s1302_s23), 7  ;;  %v1610_v24 = vld [vmem:[%s2016_s1 + $0x70] sm:$0xff]   ;;  %v1614_v28 = vld [vmem:[%s2016_s1 + $0x78] sm:$0xff]   ;;  %v1624_v36 = vld [vmem:[%s2016_s1 + $0x140] sm:$0xff]   ;;  %s2026_s12 = smov (!%p208_p5, %s1698_s12), 1 }
   0xf   : > { %1450 = vmatprep.subr.bf16.mxu1 %v1595_v9  ;;  %v1611_v25 = vld [vmem:[%s2016_s1 + $0xf0] sm:$0xff]   ;;  %s1560_s24 = smul.u32 36, %s2024_s23  ;;  %v1615_v29 = vld [vmem:[%s2016_s1 + $0xf8] sm:$0xff]   ;;  %v1625_v37 = vld [vmem:[%s2016_s1 + $0x100] sm:$0xff]   ;;  %s1306_s9 = sshll.u32 %s2026_s12, 1 }
  0x10   : > { %v1612_v26 = vld [vmem:[%s2016_s1 + $0x30] sm:$0xff]   ;;  %v1616_v30 = vld [vmem:[%s2016_s1 + $0x38] sm:$0xff]   ;;  %v1626_v38 = vld [vmem:[%s2016_s1 + $0x1c0] sm:$0xff]   ;;  %s1997_s16 = scalar_lea.vmem %s2018_s3, %s1306_s9  ;;  %s1305_s12 = sshll.u32 %s2024_s23, 2 }
  0x11   : > { %1423 = vmatpush3.bf16.msra.mxu0 %v1596_v10  ;;  %v1613_v27 = vld [vmem:[%s2016_s1 + $0xb0] sm:$0xff]   ;;  %s1846_s8 = scalar_lea.vmem %s2015_s0, %s1560_s24  ;;  %v1617_v31 = vld [vmem:[%s2016_s1 + $0xb8] sm:$0xff]   ;;  %v1627_v39 = vld [vmem:[%s2016_s1 + $0x180] sm:$0xff]   ;;  %s205_s18 = scalar_lea.vmem %s2017_s2, %s1305_s12 }
  0x12   : > { %1451 = vmatpush3.bf16.msra.mxu1 %v1597_v11  ;;  %1424 = vmatprep.subr.bf16.mxu0 %v1598_v12  ;;  %v1618_v32 = vld [vmem:[%s1846_s8] ss:$36 sps:$4 sm:$0xff]   ;;  %v1621_v34 = vld [vmem:[%s1846_s8 + $0x8] ss:$36 sps:$4 sm:$0xff]   ;;  %v1632_v44 = vld [vmem:[%s2016_s1 + $0x150] sm:$0xff]  }
  0x13   : > { %1452 = vmatprep.subr.bf16.mxu1 %v1599_v13  ;;  %v1620_v33 = vld [vmem:[%s1846_s8 + $0x4] ss:$36 sps:$4 sm:$0xff]   ;;  %v1623_v35 = vld [vmem:[%s1846_s8 + $0xc] ss:$36 sps:$4 sm:$0xff]   ;;  %v1636_v48 = vld [vmem:[%s2016_s1 + $0x158] sm:$0xff]  }
  0x14   : > { %938 = vmatprep.mubr.bf16.mxu0 %v1620_v33  ;;  %987 = vmatprep.mubr.bf16.mxu1 %v1623_v35  ;;  %v1628_v40 = vld [vmem:[%s2016_s1 + $0x148] sm:$0xff]   ;;  %v1633_v45 = vld [vmem:[%s2016_s1 + $0x110] sm:$0xff]   ;;  %v1637_v49 = vld [vmem:[%s2016_s1 + $0x118] sm:$0xff]  }
  0x15   : > { %1425 = vmatpush3.bf16.msra.mxu0 %v1600_v14  ;;  %v1629_v41 = vld [vmem:[%s2016_s1 + $0x108] sm:$0xff]   ;;  %v1634_v46 = vld [vmem:[%s2016_s1 + $0x1d0] sm:$0xff]   ;;  %v1638_v50 = vld [vmem:[%s2016_s1 + $0x1d8] sm:$0xff]  }
  0x16   : > { %1453 = vmatpush3.bf16.msra.mxu1 %v1601_v15  ;;  %1426 = vmatprep.subr.bf16.mxu0 %v1602_v16  ;;  %v1630_v42 = vld [vmem:[%s2016_s1 + $0x1c8] sm:$0xff]   ;;  %v1635_v47 = vld [vmem:[%s2016_s1 + $0x190] sm:$0xff]   ;;  %v1639_v51 = vld [vmem:[%s2016_s1 + $0x198] sm:$0xff]  }
  0x17   : > { %1454 = vmatprep.subr.bf16.mxu1 %v1603_v17  ;;  %v1631_v43 = vld [vmem:[%s2016_s1 + $0x188] sm:$0xff]   ;;  %v1640_v52 = vld [vmem:[%s2016_s1 + $0x160] sm:$0xff]   ;;  %v1647_v58 = vld [vmem:[%s1846_s8 + $0x54] ss:$36 sps:$4 sm:$0xff]  }
  0x18   : > { %v1641_v53 = vld [vmem:[%s2016_s1 + $0x120] sm:$0xff]   ;;  %v1644_v56 = vld [vmem:[%s2016_s1 + $0x168] sm:$0xff]   ;;  %v1651_v61 = vld [vmem:[%s1846_s8 + $0x50] ss:$36 sps:$4 sm:$0xff]  }
  0x19   : > { %1427 = vmatpush3.bf16.msra.mxu0 %v1604_v18  ;;  %v1642_v54 = vld [vmem:[%s2016_s1 + $0x1e0] sm:$0xff]   ;;  %v1645_v57 = vld [vmem:[%s1846_s8 + $0x4c] ss:$36 sps:$4 sm:$0xff]   ;;  %v1658_v4 = vld [vmem:[%s2016_s1 + $0x178] sm:$0xff]  }
  0x1a   : > { %1455 = vmatpush3.bf16.msra.mxu1 %v1605_v19  ;;  %1428 = vmatprep.subr.bf16.mxu0 %v1606_v20  ;;  %v1643_v55 = vld [vmem:[%s2016_s1 + $0x1a0] sm:$0xff]   ;;  %v1649_v59 = vld [vmem:[%s2016_s1 + $0x128] sm:$0xff]   ;;  %v1654_v0 = vld [vmem:[%s2016_s1 + $0x170] sm:$0xff]  }
  0x1b   : > { %1456 = vmatprep.subr.bf16.mxu1 %v1607_v21  ;;  %v1650_v60 = vld [vmem:[%s1846_s8 + $0x48] ss:$36 sps:$4 sm:$0xff]   ;;  %v1655_v1 = vld [vmem:[%s2016_s1 + $0x130] sm:$0xff]   ;;  %v1659_v5 = vld [vmem:[%s2016_s1 + $0x138] sm:$0xff]  }
  0x1c   : > { %v1652_v62 = vld [vmem:[%s2016_s1 + $0x1e8] sm:$0xff]   ;;  %v1656_v2 = vld [vmem:[%s2016_s1 + $0x1f0] sm:$0xff]   ;;  %v1660_v6 = vld [vmem:[%s2016_s1 + $0x1f8] sm:$0xff]  }
  0x1d   : > { %1429 = vmatpush3.bf16.msra.mxu0 %v1608_v22  ;;  %v1653_v63 = vld [vmem:[%s2016_s1 + $0x1a8] sm:$0xff]   ;;  %v1657_v3 = vld [vmem:[%s2016_s1 + $0x1b0] sm:$0xff]   ;;  %v1664_v9 = vld [vmem:[%s2016_s1 + $0x1b8] sm:$0xff]  }
  0x1e   : > { %1457 = vmatpush3.bf16.msra.mxu1 %v1609_v23  ;;  %1430 = vmatprep.subr.bf16.mxu0 %v1610_v24  ;;  %v1661_v7 = vld [vmem:[%s1846_s8 + $0x10] ss:$36 sps:$4 sm:$0xff]   ;;  %v1665_v10 = vld [vmem:[%s2016_s1 + $0x200] sm:$0xff]   ;;  %v1666_v11 = vld [vmem:[%s1846_s8 + $0x18] ss:$36 sps:$4 sm:$0xff]  }
  0x1f   : > { %1458 = vmatprep.subr.bf16.mxu1 %v1611_v25  ;;  %v1663_v8 = vld [vmem:[%s1846_s8 + $0x14] ss:$36 sps:$4 sm:$0xff]   ;;  %v1668_v12 = vld [vmem:[%s1846_s8 + $0x1c] ss:$36 sps:$4 sm:$0xff]   ;;  %v1669_v13 = vld [vmem:[%s2016_s1 + $0x208] sm:$0xff]  }
  0x20   : > { %v1670_v14 = vld [vmem:[%s1846_s8 + $0x5c] ss:$36 sps:$4 sm:$0xff]   ;;  %v1673_v16 = vld [vmem:[%s2016_s1 + $0x210] sm:$0xff]   ;;  %v1674_v17 = vld [vmem:[%s1846_s8 + $0x64] ss:$36 sps:$4 sm:$0xff]  }
  0x21   : > { %1431 = vmatpush3.bf16.msra.mxu0 %v1612_v26  ;;  %v1672_v15 = vld [vmem:[%s1846_s8 + $0x58] ss:$36 sps:$4 sm:$0xff]   ;;  %v1676_v18 = vld [vmem:[%s1846_s8 + $0x60] ss:$36 sps:$4 sm:$0xff]   ;;  %v1679_v22 = vld [vmem:[%s2016_s1 + $0x228] sm:$0xff]   ;;  %v1708_v26 = vmov 0.0  }
  0x22   : > { %1459 = vmatpush3.bf16.msra.mxu1 %v1613_v27  ;;  %1432 = vmatprep.subr.bf16.mxu0 %v1614_v28  ;;  %v1677_v19 = vld [vmem:[%s2016_s1 + $0x218] sm:$0xff]   ;;  %v1678_v20 = vld [vmem:[%s2016_s1 + $0x220] sm:$0xff]   ;;  %v1680_v23 = vld [vmem:[%s2016_s1 + $0x230] sm:$0xff]   ;;  %217 = vst [vmem:[%s1997_s16] sm:$0x3] %v1708_v26 }
  0x23   : > { %1460 = vmatprep.subr.bf16.mxu1 %v1615_v29  ;;  %v1682_v21 = vld [vmem:[%s1846_s8 + $0x20] ss:$36 sps:$4 sm:$0xff]   ;;  %v1681_v24 = vld [vmem:[%s2016_s1 + $0x238] sm:$0xff]   ;;  %v1683_v25 = vld [vmem:[%s1846_s8 + $0x68] ss:$36 sps:$4 sm:$0xff]  }
  0x25   : > { %1433 = vmatpush3.bf16.msra.mxu0 %v1616_v30 }
  0x26   : > { %1461 = vmatpush3.bf16.msra.mxu1 %v1617_v31  ;;  %1474 = vmatprep.subr.bf16.mxu0 %v1624_v36 }
  0x27   : > { %1502 = vmatprep.subr.bf16.mxu1 %v1626_v38 }
  0x28   : > { %939 = vmatmul.mubr.bf16.vlgmr.msra.gmra.mrb[0].mxu0 %v1618_v32 }
  0x29   : > { %988 = vmatmul.mubr.bf16.vlgmr.msra.gmra.mrb[0].mxu1 %v1621_v34  ;;  %1475 = vmatpush3.bf16.msra.mxu0 %v1625_v37 }
  0x2a   : > { %1503 = vmatpush3.bf16.msra.mxu1 %v1627_v39  ;;  %1476 = vmatprep.subr.bf16.mxu0 %v1628_v40 }
  0x2b   : > { %1504 = vmatprep.subr.bf16.mxu1 %v1630_v42  ;;  %946 = vmatprep.mubr.bf16.mxu0 %v1645_v57 }
  0x2c   : > { %995 = vmatprep.mubr.bf16.mxu1 %v1647_v58 }
  0x2d   : > { %1477 = vmatpush3.bf16.msra.mxu0 %v1629_v41 }
  0x2e   : > { %1505 = vmatpush3.bf16.msra.mxu1 %v1631_v43  ;;  %1478 = vmatprep.subr.bf16.mxu0 %v1632_v44 }
  0x2f   : > { %1506 = vmatprep.subr.bf16.mxu1 %v1634_v46 }
  0x30   : > { %947 = vmatmul.mubr.bf16.gmra.mrb[4].mxu0 %v1650_v60 }
  0x31   : > { %1479 = vmatpush3.bf16.msra.mxu0 %v1633_v45  ;;  %996 = vmatmul.mubr.bf16.gmra.mrb[4].mxu1 %v1651_v61 }
  0x32   : > { %1507 = vmatpush3.bf16.msra.mxu1 %v1635_v47  ;;  %1480 = vmatprep.subr.bf16.mxu0 %v1636_v48 }
  0x33   : > { %1508 = vmatprep.subr.bf16.mxu1 %v1638_v50  ;;  %1036 = vmatprep.mubr.bf16.mxu0 %v1663_v8 }
  0x34   : > { %1085 = vmatprep.mubr.bf16.mxu1 %v1668_v12 }
  0x35   : > { %1481 = vmatpush3.bf16.msra.mxu0 %v1637_v49 }
  0x36   : > { %1509 = vmatpush3.bf16.msra.mxu1 %v1639_v51  ;;  %1482 = vmatprep.subr.bf16.mxu0 %v1640_v52 }
  0x37   : > { %1510 = vmatprep.subr.bf16.mxu1 %v1642_v54 }
  0x39   : > { %1483 = vmatpush3.bf16.msra.mxu0 %v1641_v53 }
  0x3a   : > { %1511 = vmatpush3.bf16.msra.mxu1 %v1643_v55  ;;  %1484 = vmatprep.subr.bf16.mxu0 %v1644_v56 }
  0x3b   : > { %1512 = vmatprep.subr.bf16.mxu1 %v1652_v62 }
  0x3d   : > { %1485 = vmatpush3.bf16.msra.mxu0 %v1649_v59 }
  0x3e   : > { %1513 = vmatpush3.bf16.msra.mxu1 %v1653_v63  ;;  %1486 = vmatprep.subr.bf16.mxu0 %v1654_v0 }
  0x3f   : > { %1514 = vmatprep.subr.bf16.mxu1 %v1656_v2 }
  0x41   : > { %1487 = vmatpush3.bf16.msra.mxu0 %v1655_v1 }
  0x42   : > { %1515 = vmatpush3.bf16.msra.mxu1 %v1657_v3  ;;  %1488 = vmatprep.subr.bf16.mxu0 %v1658_v4 }
  0x43   : > { %1516 = vmatprep.subr.bf16.mxu1 %v1660_v6 }
  0x45   : > { %1489 = vmatpush3.bf16.msra.mxu0 %v1659_v5 }
  0x46   : > { %1517 = vmatpush3.bf16.msra.mxu1 %v1664_v9  ;;  %1540 = vmatprep.subr.bf16.mxu0 %v1665_v10 }
  0x48   : > { %1037 = vmatmul.mubr.bf16.vlgmr.msra.gmra.mrb[8].mxu0 %v1661_v7 }
  0x49   : > { %1541 = vmatpush3.bf16.msra.mxu0 %v1665_v10  ;;  %1086 = vmatmul.mubr.bf16.vlgmr.msra.gmra.mrb[8].mxu1 %v1666_v11 }
  0x4a   : > { %1542 = vmatprep.subr.bf16.mxu0 %v1669_v13  ;;  %1044 = vmatprep.mubr.bf16.mxu0 %v1670_v14 }
  0x4b   : > { %1093 = vmatprep.mubr.bf16.mxu1 %v1674_v17 }
  0x4d   : > { %1543 = vmatpush3.bf16.msra.mxu0 %v1669_v13 }
  0x4e   : > { %1544 = vmatprep.subr.bf16.mxu0 %v1673_v16 }
  0x50   : > { %1045 = vmatmul.mubr.bf16.gmra.mrb[12].mxu0 %v1672_v15 }
  0x51   : > { %1545 = vmatpush3.bf16.msra.mxu0 %v1673_v16  ;;  %1094 = vmatmul.mubr.bf16.gmra.mrb[12].mxu1 %v1676_v18 }
  0x52   : > { %1546 = vmatprep.subr.bf16.mxu0 %v1677_v19  ;;  %1556 = vmatprep.mubr.bf16.mxu0 %v1682_v21 }
  0x55   : > { %1547 = vmatpush3.bf16.msra.mxu0 %v1677_v19 }
  0x56   : > { %1548 = vmatprep.subr.bf16.mxu0 %v1678_v20 }
  0x59   : > { %1549 = vmatpush3.bf16.msra.mxu0 %v1678_v20 }
  0x5a   : > { %1550 = vmatprep.subr.bf16.mxu0 %v1679_v22 }
  0x5d   : > { %1551 = vmatpush3.bf16.msra.mxu0 %v1679_v22 }
  0x5e   : > { %1552 = vmatprep.subr.bf16.mxu0 %v1680_v23 }
  0x61   : > { %1553 = vmatpush3.bf16.msra.mxu0 %v1680_v23 }
  0x62   : > { %1554 = vmatprep.subr.bf16.mxu0 %v1681_v24 }
  0x65   : > { %1555 = vmatpush3.bf16.msra.mxu0 %v1681_v24 }
  0x68   : > { %1557 = vmatmul.mubr.bf16.vlgmr.msra.gmra.mrb[16].mxu0 %v1683_v25 }
  0xfb   : > { %v1434_v27 = vpop.f32.mrb[0].mxu0 }
  0xfc   : > { %v1462_v28 = vpop.f32.mrb[0].mxu1  ;;  %v1435_v29 = vpop.f32.mrb[1].mxu0 }
  0xfd   : > { %v1436_v30 = vadd.f32 %v1435_v29, %v1434_v27  ;;  %v1463_v31 = vpop.f32.mrb[1].mxu1  ;;  %v1437_v32 = vpop.f32.mrb[2].mxu0 }
  0xfe   : > { %v1464_v33 = vadd.f32 %v1463_v31, %v1462_v28  ;;  %v1465_v34 = vpop.f32.mrb[2].mxu1  ;;  %v1438_v35 = vpop.f32.mrb[3].mxu0 }
  0xff   : > { %v1439_v36 = vadd.f32 %v1438_v35, %v1437_v32  ;;  %v1466_v37 = vpop.f32.mrb[3].mxu1 }
 0x100   : > { %v990_v38 = vadd.f32 %v1464_v33, %v1436_v30  ;;  %v1467_v39 = vadd.f32 %v1466_v37, %v1465_v34 }
 0x102   : > { %v993_v40 = vadd.f32 %v1467_v39, %v1439_v36 }
 0x103   : > { %v1440_v41 = vpop.f32.mrb[4].mxu0 }
 0x104   : > { %v1468_v42 = vpop.f32.mrb[4].mxu1  ;;  %v1441_v43 = vpop.f32.mrb[5].mxu0 }
 0x105   : > { %v1469_v44 = vpop.f32.mrb[5].mxu1  ;;  %v1442_v45 = vadd.f32 %v1441_v43, %v1440_v41  ;;  %v1443_v47 = vpop.f32.mrb[6].mxu0 }
 0x106   : > { %v1470_v46 = vadd.f32 %v1469_v44, %v1468_v42  ;;  %v1471_v48 = vpop.f32.mrb[6].mxu1  ;;  %v1444_v49 = vpop.f32.mrb[7].mxu0 }
 0x107   : > { %v1472_v50 = vpop.f32.mrb[7].mxu1  ;;  %v1445_v52 = vadd.f32 %v1444_v49, %v1443_v47 }
 0x108   : > { %v998_v51 = vadd.f32 %v1470_v46, %v1442_v45  ;;  %v1473_v53 = vadd.f32 %v1472_v50, %v1471_v48 }
 0x10a   : > { %v1001_v54 = vadd.f32 %v1473_v53, %v1445_v52 }
 0x11b   : > { %v1490_v55 = vpop.f32.mrb[8].mxu0 }
 0x11c   : > { %v1491_v56 = vpop.f32.mrb[9].mxu0  ;;  %v1518_v59 = vpop.f32.mrb[8].mxu1 }
 0x11d   : > { %v1492_v57 = vadd.f32 %v1491_v56, %v1490_v55  ;;  %v1493_v58 = vpop.f32.mrb[10].mxu0  ;;  %v1519_v63 = vpop.f32.mrb[9].mxu1  ;;  %v1173_v55 = vld [vmem:[%s1997_s16] sm:$0x3] }
 0x11e   : > { %v1494_v60 = vpop.f32.mrb[11].mxu0  ;;  %v1520_v0 = vadd.f32 %v1519_v63, %v1518_v59  ;;  %v1521_v1 = vpop.f32.mrb[10].mxu1 }
 0x11f   : > { %v1039_v61 = vadd.f32 %v1492_v57, %v990_v38  ;;  %v1495_v62 = vadd.f32 %v1494_v60, %v1493_v58  ;;  %v1522_v3 = vpop.f32.mrb[11].mxu1 }
 0x120   : > { %v1523_v4 = vadd.f32 %v1522_v3, %v1521_v1 }
 0x121   : > { %v1042_v2 = vadd.f32 %v1495_v62, %v993_v40  ;;  %v1088_v5 = vadd.f32 %v1520_v0, %v1039_v61 }
 0x123   : > { %v1496_v6 = vpop.f32.mrb[12].mxu0  ;;  %v1091_v8 = vadd.f32 %v1523_v4, %v1042_v2 }
 0x124   : > { %v1497_v7 = vpop.f32.mrb[13].mxu0  ;;  %v1524_v11 = vpop.f32.mrb[12].mxu1 }
 0x125   : > { %v1498_v9 = vadd.f32 %v1497_v7, %v1496_v6  ;;  %v1499_v10 = vpop.f32.mrb[14].mxu0  ;;  %v1525_v15 = vpop.f32.mrb[13].mxu1 }
 0x126   : > { %v1500_v12 = vpop.f32.mrb[15].mxu0  ;;  %v1526_v16 = vadd.f32 %v1525_v15, %v1524_v11  ;;  %v1527_v17 = vpop.f32.mrb[14].mxu1 }
 0x127   : > { %v1047_v13 = vadd.f32 %v1498_v9, %v998_v51  ;;  %v1501_v14 = vadd.f32 %v1500_v12, %v1499_v10  ;;  %v1528_v19 = vpop.f32.mrb[15].mxu1 }
 0x128   : > { %v1529_v20 = vadd.f32 %v1528_v19, %v1527_v17 }
 0x129   : > { %v1050_v18 = vadd.f32 %v1501_v14, %v1001_v54  ;;  %v1096_v21 = vadd.f32 %v1526_v16, %v1047_v13 }
 0x12b   : > { %v1099_v22 = vadd.f32 %v1529_v20, %v1050_v18 }
 0x13b   : > { %v1558_v23 = vpop.f32.mrb[16].mxu0 }
 0x13c   : > { %v1145_v24 = vadd.f32 %v1558_v23, %v1096_v21  ;;  %v1136_v25 = vpop.f32.mrb[17].mxu0 }
 0x13d   : > { %v1137_v26 = vadd.f32 %v1136_v25, %v1088_v5  ;;  %v1559_v27 = vpop.f32.mrb[18].mxu0 }
 0x13e   : > { %v1148_v28 = vadd.f32 %v1559_v27, %v1099_v22  ;;  %v1139_v29 = vpop.f32.mrb[19].mxu0  ;;  %v1162_v36 = vmul.f32 %v1145_v24, %v1145_v24 }
 0x13f   : > { %v1140_v30 = vadd.f32 %v1139_v29, %v1091_v8  ;;  %v1160_v32 = vmul.f32 %v1137_v26, %v1137_v26 }
 0x140   : > { %v1415_v31 = vpack.c.bf16 %v1148_v28, %v1145_v24  ;;  %v1163_v39 = vmul.f32 %v1148_v28, %v1148_v28 }
 0x141   : > { %v1151_v33 = vadd.f32 %v1140_v30, %v1137_v26  ;;  %v1161_v34 = vmul.f32 %v1140_v30, %v1140_v30  ;;  %v1410_v35 = vpack.c.bf16 %v1140_v30, %v1137_v26 }
 0x142   : > { %1417 = vst [vmem:[%s205_s18 + $0x8] sm:$0xff] %v1415_v31  }
 0x143   : > { %v1152_v37 = vadd.f32 %v1151_v33, %v1145_v24  ;;  %v1164_v38 = vadd.f32 %v1161_v34, %v1160_v32  ;;  %1411 = vst [vmem:[%s205_s18] sm:$0xff] %v1410_v35  }
 0x145   : > { %v1153_v40 = vadd.f32 %v1152_v37, %v1148_v28  ;;  %v1165_v41 = vadd.f32 %v1164_v38, %v1162_v36 }
 0x147   : > { %v1154_v42 = vrot.slane %v1153_v40, 4  ;;  %v1166_v43 = vadd.f32 %v1165_v41, %v1163_v39 }
 0x149   : > { %v1155_v44 = vadd.f32 %v1154_v42, %v1153_v40  ;;  %v1167_v45 = vrot.slane %v1166_v43, 4 }
 0x14b   : > { %v1156_v46 = vrot.slane %v1155_v44, 2  ;;  %v1168_v47 = vadd.f32 %v1167_v45, %v1166_v43 }
 0x14d   : > { %v1157_v48 = vadd.f32 %v1156_v46, %v1155_v44  ;;  %v1169_v49 = vrot.slane %v1168_v47, 2 }
 0x14f   : > { %v1158_v50 = vrot.slane %v1157_v48, 1  ;;  %v1170_v51 = vadd.f32 %v1169_v49, %v1168_v47 }
 0x151   : > { %v1171_v52 = vrot.slane %v1170_v51, 1  ;;  %v1159_v53 = vadd.f32 %v1158_v50, %v1157_v48 }
 0x153   : > { %v1172_v54 = vadd.f32 %v1171_v52, %v1170_v51 }
 0x155   : > { %v1175_v56 = vsel %vm1174_vm0, %v1159_v53, %v1172_v54 }
 0x156   : > { %v1176_v57 = vadd.f32 %v1175_v56, %v1173_v55 }
 0x158   : > { %1177 = vst [vmem:[%s1997_s16] sm:$0x3] %v1176_v57 }
 0x159 PF: > { %s14_s14 = sadd.s32 1, %s1706_s14   ;;  %s2019_s12 = smov %s1702_s13 }
 0x15a   : > { %p11_p6 = scmp.ge.s32.totalorder %s14_s14, 4   ;;  %s2020_s13 = smov %s2022_s15 }
 0x15c   :  { %13 = sbr.rel (!%p11_p6) target bundleno = 2 (0x2), region = 74 }

// kernel: conv_block_forward.7
= control target key start
LH: loop header
LB: loop body
LE: loop exit
PB: predicated region body
PF: predicated region fallthrough
CT: control target
= control target key end

     0   :  { %s203_s0 = inlined_call_operand.vmem [shape: bf16[64,128], index: 0, kind: input, shape index: {}]   ;;  %s204_s1 = inlined_call_operand.vmem [shape: f32[1,128], index: 1, kind: input, shape index: {}]   ;;  %s205_s2 = inlined_call_operand.vmem [shape: f32[1,128], index: 2, kind: input, shape index: {}]   ;;  %s206_s3 = inlined_call_operand.vmem [shape: f32[64,128], index: 3, kind: output, shape index: {}]  }
   0x1   :  { %v107_v0 = vld [vmem:[%s203_s0] sm:$0xff]   ;;  %v122_v4 = vld [vmem:[%s203_s0 + $0x8] sm:$0xff]   ;;  %v123_v5 = vld [vmem:[%s203_s0 + $0x10] sm:$0xff]  }
   0x2   :  { %v104_v1 = vld [vmem:[%s204_s1] ss:$0 sm:$0xff]  ;;  %v108_v2 = vunpack.c.l.bf16 %v107_v0  ;;  %v109_v3 = vunpack.c.h.bf16 %v107_v0  ;;  %v124_v6 = vld [vmem:[%s203_s0 + $0x18] sm:$0xff]   ;;  %v112_v8 = vunpack.c.l.bf16 %v122_v4  ;;  %v113_v9 = vunpack.c.h.bf16 %v122_v4 }
   0x3   :  { %v105_v7 = vld [vmem:[%s205_s2] ss:$0 sm:$0xff]  ;;  %v116_v10 = vunpack.c.l.bf16 %v123_v5  ;;  %v117_v11 = vunpack.c.h.bf16 %v123_v5  ;;  %v120_v14 = vunpack.c.l.bf16 %v124_v6  ;;  %v121_v15 = vunpack.c.h.bf16 %v124_v6 }
   0x4   :  { %v37_v12 = vmul.f32 %v108_v2, %v104_v1  ;;  %v38_v13 = vmul.f32 %v109_v3, %v104_v1  ;;  %v39_v16 = vmul.f32 %v112_v8, %v104_v1  ;;  %v40_v17 = vmul.f32 %v113_v9, %v104_v1 }
   0x5   :  { %v41_v18 = vmul.f32 %v116_v10, %v104_v1  ;;  %v42_v19 = vmul.f32 %v117_v11, %v104_v1  ;;  %v43_v22 = vmul.f32 %v120_v14, %v104_v1  ;;  %v44_v23 = vmul.f32 %v121_v15, %v104_v1 }
   0x6   :  { %v52_v20 = vadd.f32 %v105_v7, %v37_v12  ;;  %v53_v21 = vadd.f32 %v105_v7, %v38_v13  ;;  %v54_v24 = vadd.f32 %v105_v7, %v39_v16  ;;  %v55_v25 = vadd.f32 %v105_v7, %v40_v17 }
   0x7   :  { %v56_v26 = vadd.f32 %v105_v7, %v41_v18  ;;  %v57_v27 = vadd.f32 %v105_v7, %v42_v19  ;;  %v58_v30 = vadd.f32 %v105_v7, %v43_v22  ;;  %v59_v33 = vadd.f32 %v105_v7, %v44_v23 }
   0x8   :  { %v60_v28 = vmul.f32 0.5, %v52_v20  ;;  %v61_v29 = vmul.f32 0.5, %v53_v21  ;;  %v62_v31 = vmul.f32 0.5, %v54_v24  ;;  %v63_v32 = vmul.f32 0.5, %v55_v25 }
   0x9   :  { %v64_v34 = vmul.f32 0.5, %v56_v26  ;;  %v65_v35 = vmul.f32 0.5, %v57_v27  ;;  %v66_v36 = vmul.f32 0.5, %v58_v30  ;;  %v67_v37 = vmul.f32 0.5, %v59_v33 }
   0xa   :  { %125 = vtanh.f32 %v60_v28 }
   0xb   :  { %127 = vtanh.f32 %v61_v29 }
   0xc   :  { %129 = vtanh.f32 %v62_v31 }
   0xd   :  { %131 = vtanh.f32 %v63_v32 }
   0xe   :  { %133 = vtanh.f32 %v64_v34 }
   0xf   :  { %135 = vtanh.f32 %v65_v35 }
  0x10   :  { %137 = vtanh.f32 %v66_v36 }
  0x11   :  { %139 = vtanh.f32 %v67_v37 }
  0x14   :  { %v126_v38 = vpop.eup %125 }
  0x15   :  { %v128_v39 = vpop.eup %127  ;;  %v76_v40 = vmul.f32 0.5, %v126_v38 }
  0x16   :  { %v130_v41 = vpop.eup %129  ;;  %v77_v42 = vmul.f32 0.5, %v128_v39 }
  0x17   :  { %v132_v43 = vpop.eup %131  ;;  %v84_v44 = vadd.f32 0.5, %v76_v40  ;;  %v78_v45 = vmul.f32 0.5, %v130_v41 }
  0x18   :  { %v134_v46 = vpop.eup %133  ;;  %v85_v47 = vadd.f32 0.5, %v77_v42  ;;  %v79_v48 = vmul.f32 0.5, %v132_v43 }
  0x19   :  { %v136_v49 = vpop.eup %135  ;;  %92 = vst [vmem:[%s206_s3] sm:$0xff] %v84_v44  ;;  %v86_v50 = vadd.f32 0.5, %v78_v45  ;;  %v80_v51 = vmul.f32 0.5, %v134_v46 }
  0x1a   :  { %v138_v52 = vpop.eup %137  ;;  %93 = vst [vmem:[%s206_s3 + $0x8] sm:$0xff] %v85_v47  ;;  %v87_v53 = vadd.f32 0.5, %v79_v48  ;;  %v81_v54 = vmul.f32 0.5, %v136_v49 }
  0x1b   :  { %v140_v55 = vpop.eup %139  ;;  %94 = vst [vmem:[%s206_s3 + $0x10] sm:$0xff] %v86_v50  ;;  %v88_v56 = vadd.f32 0.5, %v80_v51  ;;  %v82_v57 = vmul.f32 0.5, %v138_v52 }
  0x1c   :  { %95 = vst [vmem:[%s206_s3 + $0x18] sm:$0xff] %v87_v53  ;;  %v89_v58 = vadd.f32 0.5, %v81_v54  ;;  %v83_v59 = vmul.f32 0.5, %v140_v55 }
  0x1d   :  { %96 = vst [vmem:[%s206_s3 + $0x20] sm:$0xff] %v88_v56  ;;  %v90_v60 = vadd.f32 0.5, %v82_v57 }
  0x1e   :  { %97 = vst [vmem:[%s206_s3 + $0x28] sm:$0xff] %v89_v58  ;;  %v91_v61 = vadd.f32 0.5, %v83_v59 }
  0x1f   :  { %98 = vst [vmem:[%s206_s3 + $0x30] sm:$0xff] %v90_v60 }
  0x20   :  { %99 = vst [vmem:[%s206_s3 + $0x38] sm:$0xff] %v91_v61 }

</bundles_post_ra>
